<compile_context>
chip_gen: v5e
topology: v5e:2x2
jax: 0.10.0
libtpu: 0.0.40
codegen_flags: <defaults>
</compile_context>

<pallas_src>
import functools
import math

import jax
import jax.numpy as jnp
from jax.experimental import pallas as pl
from jax.experimental.pallas import tpu as pltpu

VMEM = pltpu.MemorySpace.VMEM
SMEM = pltpu.MemorySpace.SMEM


# ------------------------------- Linear (MXU) -------------------------------

def _linear_kernel(x_ref, w_ref, b_ref, o_ref, *, activation):
    y = jnp.dot(x_ref[...], w_ref[...], preferred_element_type=jnp.float32)
    y = y + b_ref[...]
    if activation == "gelu":
        # TODO(synk): DistilBERT uses exact erf-GELU; tanh approximation used
        # for guaranteed Mosaic lowering (~1e-3 per-activation deviation).
        y = jax.nn.gelu(y, approximate=True)
    o_ref[...] = y.astype(o_ref.dtype)


def linear(x, w, b, activation=None, out_dtype=jnp.bfloat16):
    """y = act(x @ w + b); bf16 MXU inputs, f32 accumulation.

    Weight + bias use a constant block index so they are DMA'd into VMEM once
    and stay resident across all row tiles (DistilBERT-size weights <= ~5 MB).
    """
    # TODO(synk): layers whose bf16 weights exceed ~16 MB would need K/N tiling
    # with an f32 accumulator; never the case for DistilBERT dims.
    n, din = x.shape
    dout = w.shape[1]
    tm = n if n <= 256 else 256
    grid = (pl.cdiv(n, tm),)
    return pl.pallas_call(
        functools.partial(_linear_kernel, activation=activation),
        out_shape=jax.ShapeDtypeStruct((n, dout), out_dtype),
        grid_spec=pltpu.PrefetchScalarGridSpec(
            num_scalar_prefetch=0, grid=grid,
            in_specs=[
                pl.BlockSpec((tm, din), lambda i: (i, 0)),
                pl.BlockSpec((din, dout), lambda i: (0, 0)),   # resident weight
                pl.BlockSpec((1, dout), lambda i: (0, 0)),     # resident bias
            ],
            out_specs=pl.BlockSpec((tm, dout), lambda i: (i, 0))),
        compiler_params=pltpu.CompilerParams(
            dimension_semantics=("parallel",)),
    )(x.astype(jnp.bfloat16), w.astype(jnp.bfloat16),
      b.astype(jnp.float32).reshape(1, dout))


# ------------------------------- LayerNorm ----------------------------------

def _ln_finish(x, g_ref, b_ref, o_ref):
    # Single-pass statistics: E[x] and E[x^2] (shorter reduction chain).
    mu = jnp.mean(x, axis=-1, keepdims=True)
    ex2 = jnp.mean(x * x, axis=-1, keepdims=True)
    var = jnp.maximum(ex2 - mu * mu, 0.0)
    y = (x - mu) * jax.lax.rsqrt(var + 1e-12)          # DistilBERT eps
    o_ref[...] = (y * g_ref[...] + b_ref[...]).astype(o_ref.dtype)


def _ln_kernel(x_ref, g_ref, b_ref, o_ref):
    _ln_finish(x_ref[...].astype(jnp.float32), g_ref, b_ref, o_ref)


def _add_ln_kernel(x_ref, r_ref, g_ref, b_ref, o_ref):
    x = x_ref[...].astype(jnp.float32) + r_ref[...].astype(jnp.float32)
    _ln_finish(x, g_ref, b_ref, o_ref)


def layernorm(x, g, b, residual=None, out_dtype=jnp.bfloat16):
    """LayerNorm(x [+ residual]); residual add done in f32 inside the kernel."""
    # TODO(synk): the hidden stream between kernels is bf16 (PyTorch ref is
    # f32); adds a small, distillation-tolerant deviation over 6 layers.
    n, d = x.shape
    tr = n if n <= 512 else 512
    grid = (pl.cdiv(n, tr),)
    row_spec = pl.BlockSpec((tr, d), lambda i: (i, 0))
    vec_spec = pl.BlockSpec((1, d), lambda i: (0, 0))
    g2 = g.astype(jnp.float32).reshape(1, d)
    b2 = b.astype(jnp.float32).reshape(1, d)
    if residual is None:
        kern, args = _ln_kernel, (x, g2, b2)
        in_specs = [row_spec, vec_spec, vec_spec]
    else:
        kern, args = _add_ln_kernel, (x, residual, g2, b2)
        in_specs = [row_spec, row_spec, vec_spec, vec_spec]
    return pl.pallas_call(
        kern,
        out_shape=jax.ShapeDtypeStruct((n, d), out_dtype),
        grid_spec=pltpu.PrefetchScalarGridSpec(
            num_scalar_prefetch=0, grid=grid,
            in_specs=in_specs, out_specs=row_spec),
        compiler_params=pltpu.CompilerParams(
            dimension_semantics=("parallel",)),
    )(*args)


# ------------------------------- Attention -----------------------------------

def _mha_heads(q, k, v, bias, *, n, hd, scale, out_dtype):
    """q/k/v: (S, n*hd) bf16 with heads side-by-side; bias: (1, S) f32 additive
    key mask (0 / -1e30). Returns (S, n*hd) context in out_dtype."""
    ctxs = []
    for h in range(n):
        lo, hi = h * hd, (h + 1) * hd
        qh = q[:, lo:hi] * scale                      # scale on (S,hd), not (S,S)
        s = jnp.einsum("qd,kd->qk", qh, k[:, lo:hi],
                       preferred_element_type=jnp.float32)
        s = s + bias                                  # additive mask, no where
        s = s - jnp.max(s, axis=-1, keepdims=True)
        p = jnp.exp(s)
        p = p * pl.reciprocal(jnp.sum(p, axis=-1, keepdims=True), approx=True)
        ctxs.append(jnp.einsum("qk,kd->qd", p.astype(v.dtype), v[:, lo:hi],
                               preferred_element_type=jnp.float32))
    ctx = ctxs[0] if len(ctxs) == 1 else jnp.concatenate(ctxs, axis=-1)
    return ctx.astype(out_dtype)


def _attn_grouped_kernel(q_ref, k_ref, v_ref, b_ref, o_ref, *, g, hd, scale):
    o_ref[0] = _mha_heads(q_ref[0], k_ref[0], v_ref[0], b_ref[0],
                          n=g, hd=hd, scale=scale, out_dtype=o_ref.dtype)


def _attn_slab_kernel(qkv_ref, b_ref, o_ref, *, n_heads, hd, scale):
    d = n_heads * hd
    qkv = qkv_ref[0]
    o_ref[0] = _mha_heads(qkv[:, :d], qkv[:, d:2 * d], qkv[:, 2 * d:3 * d],
                          b_ref[0], n=n_heads, hd=hd, scale=scale,
                          out_dtype=o_ref.dtype)


def attention(qkv, mask_bias, *, n_heads, head_dim, out_dtype=jnp.bfloat16):
    """qkv: (B, S, 3D) bf16 (q | k | v along the last dim, heads contiguous);
    mask_bias: (B, S) f32 additive mask.  Returns context in (B, S, D)."""
    B, S, D3 = qkv.shape
    D = D3 // 3
    H, hd = n_heads, head_dim
    scale = 1.0 / math.sqrt(hd)
    bias = mask_bias.reshape(B, 1, S)

    # Smallest head group g (dividing H) whose lane width g*hd is 128-aligned.
    g = next((c for c in range(1, H + 1)
              if H % c == 0 and (c * hd) % 128 == 0), None)

    if g is not None:
        ng = H // g
        gw = g * hd
        # TODO(synk): for S >> 512 add a KV-tile grid axis with flash-style
        # online softmax; unnecessary at DistilBERT's max S=512.
        return pl.pallas_call(
            functools.partial(_attn_grouped_kernel, g=g, hd=hd, scale=scale),
            out_shape=jax.ShapeDtypeStruct((B, S, D), out_dtype),
            grid_spec=pltpu.PrefetchScalarGridSpec(
                num_scalar_prefetch=0, grid=(B, ng),
                in_specs=[
                    pl.BlockSpec((1, S, gw), lambda b, h: (b, 0, h)),
                    pl.BlockSpec((1, S, gw), lambda b, h, ng=ng: (b, 0, ng + h)),
                    pl.BlockSpec((1, S, gw),
                                 lambda b, h, ng=ng: (b, 0, 2 * ng + h)),
                    pl.BlockSpec((1, 1, S), lambda b, h: (b, 0, 0)),
                ],
                out_specs=pl.BlockSpec((1, S, gw), lambda b, h: (b, 0, h))),
            compiler_params=pltpu.CompilerParams(
                dimension_semantics=("parallel", "parallel")),
        )(qkv, bias)

    # Fallback for tiny configs with no lane-aligned head group: one batch
    # element's full (S, 3D) slab per grid step, head split done in-kernel.
    return pl.pallas_call(
        functools.partial(_attn_slab_kernel, n_heads=H, hd=hd, scale=scale),
        out_shape=jax.ShapeDtypeStruct((B, S, D), out_dtype),
        grid_spec=pltpu.PrefetchScalarGridSpec(
            num_scalar_prefetch=0, grid=(B,),
            in_specs=[
                pl.BlockSpec((1, S, D3), lambda b: (b, 0, 0)),
                pl.BlockSpec((1, 1, S), lambda b: (b, 0, 0)),
            ],
            out_specs=pl.BlockSpec((1, S, D), lambda b: (b, 0, 0))),
        compiler_params=pltpu.CompilerParams(
            dimension_semantics=("parallel",)),
    )(qkv, bias)


# ------------------------- CLS projection + MSE loss -------------------------

def _proj_mse_kernel(h_ref, w_ref, l_ref, o_ref):
    h = h_ref[...].astype(jnp.float32)                 # (B, D)
    w = w_ref[...].astype(jnp.float32)                 # (D, G)
    pred = jnp.dot(h, w, preferred_element_type=jnp.float32)
    d = pred - l_ref[...].astype(jnp.float32)
    o_ref[0, 0] = jnp.sum(d * d) / jnp.float32(d.size)


def proj_mse(h_cls, proj_w, labels):
    """loss = MSE(h_cls @ proj, labels); fused so the (B, gnn_dim) prediction
    never hits HBM (avoids a sub-128-lane masked store)."""
    out = pl.pallas_call(
        _proj_mse_kernel,
        out_shape=jax.ShapeDtypeStruct((1, 1), jnp.float32),
        in_specs=[pl.BlockSpec(memory_space=VMEM)] * 3,
        out_specs=pl.BlockSpec(memory_space=SMEM),
    )(h_cls, proj_w, labels)
    return out[0, 0]


# ------------------------- Parameter initialization --------------------------

def init_params(key, *, vocab, max_pos, dim, n_layers, n_heads, hidden_dim,
                gnn_dim):
    del n_heads
    std = 0.02  # HF initializer_range default
    keys = jax.random.split(key, 3 + n_layers)
    params = {
        "word_emb": jax.random.normal(keys[0], (vocab, dim), jnp.float32) * std,
        "pos_emb": jax.random.normal(keys[1], (max_pos, dim), jnp.float32) * std,
        "emb_ln_g": jnp.ones((dim,), jnp.float32),
        "emb_ln_b": jnp.zeros((dim,), jnp.float32),
        "layers": [],
    }
    for i in range(n_layers):
        ks = jax.random.split(keys[2 + i], 6)
        q_w = jax.random.normal(ks[0], (dim, dim), jnp.float32) * std
        k_w = jax.random.normal(ks[1], (dim, dim), jnp.float32) * std
        v_w = jax.random.normal(ks[2], (dim, dim), jnp.float32) * std
        layer = {
            # Fused QKV projection: one (D, 3D) bf16 weight (q | k | v).
            "qkv_w": jnp.concatenate([q_w, k_w, v_w], axis=1).astype(jnp.bfloat16),
            "qkv_b": jnp.zeros((3 * dim,), jnp.float32),
            "o_w": (jax.random.normal(ks[3], (dim, dim), jnp.float32) * std
                    ).astype(jnp.bfloat16),
            "o_b": jnp.zeros((dim,), jnp.float32),
            "sa_ln_g": jnp.ones((dim,), jnp.float32),
            "sa_ln_b": jnp.zeros((dim,), jnp.float32),
            "ffn1_w": (jax.random.normal(ks[4], (dim, hidden_dim), jnp.float32)
                       * std).astype(jnp.bfloat16),
            "ffn1_b": jnp.zeros((hidden_dim,), jnp.float32),
            "ffn2_w": (jax.random.normal(ks[5], (hidden_dim, dim), jnp.float32)
                       * std).astype(jnp.bfloat16),
            "ffn2_b": jnp.zeros((dim,), jnp.float32),
            "out_ln_g": jnp.ones((dim,), jnp.float32),
            "out_ln_b": jnp.zeros((dim,), jnp.float32),
        }
        params["layers"].append(layer)
    # proj: nn.init.xavier_uniform_ on (dim, gnn_embed_dim); no bias.
    bound = math.sqrt(6.0 / (dim + gnn_dim))
    params["proj"] = jax.random.uniform(
        keys[-1], (dim, gnn_dim), jnp.float32, -bound, bound)
    return params


# ------------------------------- Forward pass --------------------------------

def gs_distilled_forward(params, input_ids, attention_mask, labels, *, n_heads):
    """Mirrors GSDistilledModel.forward (eval semantics: dropout omitted)."""
    B, S = input_ids.shape
    D = params["word_emb"].shape[1]
    H = n_heads
    hd = D // H

    # Embeddings (gather is glue) + LayerNorm kernel.
    x = params["word_emb"][input_ids] + params["pos_emb"][:S][None, :, :]
    x = x.reshape(B * S, D)
    x = layernorm(x, params["emb_ln_g"], params["emb_ln_b"])          # bf16

    # Precomputed additive key mask: 0 where attended, -1e30 where masked.
    mask_bias = jnp.where(attention_mask > 0, 0.0, -1e30).astype(jnp.float32)

    for lyr in params["layers"]:
        # Fused QKV projection -> (B*S, 3D); reshape to (B, S, 3D) is free and
        # head slicing happens through the attention BlockSpecs (no transposes).
        qkv = linear(x, lyr["qkv_w"], lyr["qkv_b"]).reshape(B, S, 3 * D)
        ctx = attention(qkv, mask_bias, n_heads=H, head_dim=hd)       # (B,S,D)
        attn_out = linear(ctx.reshape(B * S, D), lyr["o_w"], lyr["o_b"])
        x = layernorm(attn_out, lyr["sa_ln_g"], lyr["sa_ln_b"], residual=x)
        h1 = linear(x, lyr["ffn1_w"], lyr["ffn1_b"], activation="gelu")
        h2 = linear(h1, lyr["ffn2_w"], lyr["ffn2_b"])
        x = layernorm(h2, lyr["out_ln_g"], lyr["out_ln_b"], residual=x)

    # h = last_hidden_state[:, 0]  (CLS token); loss = MSE(h @ proj, labels).
    h_cls = x.reshape(B, S, D)[:, 0]                                  # (B, D)
    return proj_mse(h_cls, params["proj"], labels)


# ----------------------------------- Main ------------------------------------

if __name__ == "__main__":
    # Small DistilBERT-like config.
    B, S = 2, 8
    VOCAB, MAX_POS = 100, 16
    DIM, N_HEADS, HIDDEN, N_LAYERS = 32, 4, 64, 2
    GNN_DIM = 16

    key = jax.random.PRNGKey(0)
    k_param, k_ids, k_lab = jax.random.split(key, 3)

    params = init_params(k_param, vocab=VOCAB, max_pos=MAX_POS, dim=DIM,
                         n_layers=N_LAYERS, n_heads=N_HEADS,
                         hidden_dim=HIDDEN, gnn_dim=GNN_DIM)

    input_ids = jax.random.randint(k_ids, (B, S), 0, VOCAB, dtype=jnp.int32)
    attention_mask = jnp.array(
        [[1, 1, 1, 1, 1, 1, 1, 1],
         [1, 1, 1, 1, 1, 1, 0, 0]], dtype=jnp.int32)        # exercise masking
    labels = jax.random.normal(k_lab, (B, GNN_DIM), jnp.float32)  # GNN embeddings

    # TODO(synk): tokenizer / HF checkpoint loading & save/load paths are I/O,
    # not compute, and are intentionally not reproduced.
    fwd = jax.jit(gs_distilled_forward, static_argnames=("n_heads",))
    loss = fwd(params, input_ids, attention_mask, labels, n_heads=N_HEADS)
    loss = jax.block_until_ready(loss)
    assert loss.shape == () and jnp.isfinite(loss)
    print("KERNEL_OK")
</pallas_src>

<mosaic_0001>
module attributes {stable_mosaic.version = 11 : i64} {
  func.func @_ln_kernel(%arg0: i32, %arg1: memref<16x32xf32, #tpu.memory_space<vmem>>, %arg2: memref<1x32xf32, #tpu.memory_space<vmem>>, %arg3: memref<1x32xf32, #tpu.memory_space<vmem>>, %arg4: memref<16x32xbf16, #tpu.memory_space<vmem>>) attributes {dimension_semantics = [#tpu.dimension_semantics<parallel>], iteration_bounds = array<i64: 1>, scalar_prefetch = 0 : i64, scratch_operands = 0 : i64, tpu.core_type = #tpu.core_type<tc>, window_params = [{transform_indices = @transform_0, window_bounds = array<i64: 16, 32>}, {pipeline_mode = #tpu.pipeline_mode<synchronous>, transform_indices = @transform_1, window_bounds = array<i64: 1, 32>}, {pipeline_mode = #tpu.pipeline_mode<synchronous>, transform_indices = @transform_2, window_bounds = array<i64: 1, 32>}, {transform_indices = @transform_3, window_bounds = array<i64: 16, 32>}]} {
    %c0 = arith.constant 0 : index
    %c0_0 = arith.constant 0 : index
    %0 = vector.load %arg1[%c0, %c0_0] : memref<16x32xf32, #tpu.memory_space<vmem>>, vector<16x32xf32>
    %cst = arith.constant dense<0.000000e+00> : vector<16xf32>
    %1 = vector.multi_reduction <add>, %0, %cst [1] : vector<16x32xf32> to vector<16xf32>
    %2 = vector.shape_cast %1 : vector<16xf32> to vector<16x1xf32>
    %cst_1 = arith.constant 3.200000e+01 : f32
    %3 = vector.broadcast %cst_1 : f32 to vector<16x1xf32>
    %4 = arith.divf %2, %3 : vector<16x1xf32>
    %5 = arith.mulf %0, %0 : vector<16x32xf32>
    %cst_2 = arith.constant dense<0.000000e+00> : vector<16xf32>
    %6 = vector.multi_reduction <add>, %5, %cst_2 [1] : vector<16x32xf32> to vector<16xf32>
    %7 = vector.shape_cast %6 : vector<16xf32> to vector<16x1xf32>
    %cst_3 = arith.constant 3.200000e+01 : f32
    %8 = vector.broadcast %cst_3 : f32 to vector<16x1xf32>
    %9 = arith.divf %7, %8 : vector<16x1xf32>
    %10 = arith.mulf %4, %4 : vector<16x1xf32>
    %11 = arith.subf %9, %10 : vector<16x1xf32>
    %cst_4 = arith.constant 0.000000e+00 : f32
    %12 = vector.broadcast %cst_4 : f32 to vector<16x1xf32>
    %13 = arith.maximumf %11, %12 : vector<16x1xf32>
    %14 = vector.broadcast %4 : vector<16x1xf32> to vector<16x32xf32>
    %15 = arith.subf %0, %14 : vector<16x32xf32>
    %cst_5 = arith.constant 9.99999996E-13 : f32
    %16 = vector.broadcast %cst_5 : f32 to vector<16x1xf32>
    %17 = arith.addf %13, %16 : vector<16x1xf32>
    %18 = math.rsqrt %17 : vector<16x1xf32>
    %19 = vector.broadcast %18 : vector<16x1xf32> to vector<16x32xf32>
    %20 = arith.mulf %15, %19 : vector<16x32xf32>
    %c0_6 = arith.constant 0 : index
    %c0_7 = arith.constant 0 : index
    %21 = vector.load %arg2[%c0_6, %c0_7] : memref<1x32xf32, #tpu.memory_space<vmem>>, vector<1x32xf32>
    %22 = vector.broadcast %21 : vector<1x32xf32> to vector<16x32xf32>
    %23 = arith.mulf %20, %22 : vector<16x32xf32>
    %c0_8 = arith.constant 0 : index
    %c0_9 = arith.constant 0 : index
    %24 = vector.load %arg3[%c0_8, %c0_9] : memref<1x32xf32, #tpu.memory_space<vmem>>, vector<1x32xf32>
    %25 = vector.broadcast %24 : vector<1x32xf32> to vector<16x32xf32>
    %26 = arith.addf %23, %25 : vector<16x32xf32>
    %27 = arith.truncf %26 : vector<16x32xf32> to vector<16x32xbf16>
    %c0_10 = arith.constant 0 : index
    %c0_11 = arith.constant 0 : index
    %28 = vector.load %arg4[%c0_10, %c0_11] : memref<16x32xbf16, #tpu.memory_space<vmem>>, vector<16x32xbf16>
    tpu.vector_store %arg4[%c0_10, %c0_11], %27 {strides = array<i32>} : memref<16x32xbf16, #tpu.memory_space<vmem>>, vector<16x32xbf16>,
    return
  }
  func.func @transform_0(%arg0: i32) -> (i32, i32) {
    %c0_i32 = arith.constant 0 : i32
    %c0_i32_0 = arith.constant 0 : i32
    return %arg0, %c0_i32 : i32, i32
  }
  func.func @transform_1(%arg0: i32) -> (i32, i32) {
    %c0_i32 = arith.constant 0 : i32
    %c0_i32_0 = arith.constant 0 : i32
    %c0_i32_1 = arith.constant 0 : i32
    return %c0_i32, %c0_i32_0 : i32, i32
  }
  func.func @transform_2(%arg0: i32) -> (i32, i32) {
    %c0_i32 = arith.constant 0 : i32
    %c0_i32_0 = arith.constant 0 : i32
    %c0_i32_1 = arith.constant 0 : i32
    return %c0_i32, %c0_i32_0 : i32, i32
  }
  func.func @transform_3(%arg0: i32) -> (i32, i32) {
    %c0_i32 = arith.constant 0 : i32
    %c0_i32_0 = arith.constant 0 : i32
    return %arg0, %c0_i32 : i32, i32
  }
}

module attributes {stable_mosaic.version = 11 : i64} {
  func.func @_linear_kernel(%arg0: i32, %arg1: memref<16x32xbf16, #tpu.memory_space<vmem>>, %arg2: memref<32x96xbf16, #tpu.memory_space<vmem>>, %arg3: memref<1x96xf32, #tpu.memory_space<vmem>>, %arg4: memref<16x96xbf16, #tpu.memory_space<vmem>>) attributes {dimension_semantics = [#tpu.dimension_semantics<parallel>], iteration_bounds = array<i64: 1>, scalar_prefetch = 0 : i64, scratch_operands = 0 : i64, tpu.core_type = #tpu.core_type<tc>, window_params = [{transform_indices = @transform_0, window_bounds = array<i64: 16, 32>}, {pipeline_mode = #tpu.pipeline_mode<synchronous>, transform_indices = @transform_1, window_bounds = array<i64: 32, 96>}, {pipeline_mode = #tpu.pipeline_mode<synchronous>, transform_indices = @transform_2, window_bounds = array<i64: 1, 96>}, {transform_indices = @transform_3, window_bounds = array<i64: 16, 96>}]} {
    %c0 = arith.constant 0 : index
    %c0_0 = arith.constant 0 : index
    %0 = vector.load %arg1[%c0, %c0_0] : memref<16x32xbf16, #tpu.memory_space<vmem>>, vector<16x32xbf16>
    %c0_1 = arith.constant 0 : index
    %c0_2 = arith.constant 0 : index
    %1 = vector.load %arg2[%c0_1, %c0_2] : memref<32x96xbf16, #tpu.memory_space<vmem>>, vector<32x96xbf16>
    %cst = arith.constant dense<0.000000e+00> : vector<16x96xf32>
    %2 = tpu.matmul %0, %1, %cst {dimension_numbers = #tpu.dot_dimension_numbers<[1], [0], [0], [1], [0, 0, 1, 1], [], []>} : vector<16x32xbf16>, vector<32x96xbf16>, vector<16x96xf32> -> vector<16x96xf32>
    %c0_3 = arith.constant 0 : index
    %c0_4 = arith.constant 0 : index
    %3 = vector.load %arg3[%c0_3, %c0_4] : memref<1x96xf32, #tpu.memory_space<vmem>>, vector<1x96xf32>
    %4 = vector.broadcast %3 : vector<1x96xf32> to vector<16x96xf32>
    %5 = arith.addf %2, %4 : vector<16x96xf32>
    %6 = arith.truncf %5 : vector<16x96xf32> to vector<16x96xbf16>
    %c0_5 = arith.constant 0 : index
    %c0_6 = arith.constant 0 : index
    %7 = vector.load %arg4[%c0_5, %c0_6] : memref<16x96xbf16, #tpu.memory_space<vmem>>, vector<16x96xbf16>
    tpu.vector_store %arg4[%c0_5, %c0_6], %6 {strides = array<i32>} : memref<16x96xbf16, #tpu.memory_space<vmem>>, vector<16x96xbf16>,
    return
  }
  func.func @transform_0(%arg0: i32) -> (i32, i32) {
    %c0_i32 = arith.constant 0 : i32
    %c0_i32_0 = arith.constant 0 : i32
    return %arg0, %c0_i32 : i32, i32
  }
  func.func @transform_1(%arg0: i32) -> (i32, i32) {
    %c0_i32 = arith.constant 0 : i32
    %c0_i32_0 = arith.constant 0 : i32
    %c0_i32_1 = arith.constant 0 : i32
    return %c0_i32, %c0_i32_0 : i32, i32
  }
  func.func @transform_2(%arg0: i32) -> (i32, i32) {
    %c0_i32 = arith.constant 0 : i32
    %c0_i32_0 = arith.constant 0 : i32
    %c0_i32_1 = arith.constant 0 : i32
    return %c0_i32, %c0_i32_0 : i32, i32
  }
  func.func @transform_3(%arg0: i32) -> (i32, i32) {
    %c0_i32 = arith.constant 0 : i32
    %c0_i32_0 = arith.constant 0 : i32
    return %arg0, %c0_i32 : i32, i32
  }
}

module attributes {stable_mosaic.version = 11 : i64} {
  func.func @_linear_kernel(%arg0: i32, %arg1: memref<16x32xbf16, #tpu.memory_space<vmem>>, %arg2: memref<32x32xbf16, #tpu.memory_space<vmem>>, %arg3: memref<1x32xf32, #tpu.memory_space<vmem>>, %arg4: memref<16x32xbf16, #tpu.memory_space<vmem>>) attributes {dimension_semantics = [#tpu.dimension_semantics<parallel>], iteration_bounds = array<i64: 1>, scalar_prefetch = 0 : i64, scratch_operands = 0 : i64, tpu.core_type = #tpu.core_type<tc>, window_params = [{transform_indices = @transform_0, window_bounds = array<i64: 16, 32>}, {pipeline_mode = #tpu.pipeline_mode<synchronous>, transform_indices = @transform_1, window_bounds = array<i64: 32, 32>}, {pipeline_mode = #tpu.pipeline_mode<synchronous>, transform_indices = @transform_2, window_bounds = array<i64: 1, 32>}, {transform_indices = @transform_3, window_bounds = array<i64: 16, 32>}]} {
    %c0 = arith.constant 0 : index
    %c0_0 = arith.constant 0 : index
    %0 = vector.load %arg1[%c0, %c0_0] : memref<16x32xbf16, #tpu.memory_space<vmem>>, vector<16x32xbf16>
    %c0_1 = arith.constant 0 : index
    %c0_2 = arith.constant 0 : index
    %1 = vector.load %arg2[%c0_1, %c0_2] : memref<32x32xbf16, #tpu.memory_space<vmem>>, vector<32x32xbf16>
    %cst = arith.constant dense<0.000000e+00> : vector<16x32xf32>
    %2 = tpu.matmul %0, %1, %cst {dimension_numbers = #tpu.dot_dimension_numbers<[1], [0], [0], [1], [0, 0, 1, 1], [], []>} : vector<16x32xbf16>, vector<32x32xbf16>, vector<16x32xf32> -> vector<16x32xf32>
    %c0_3 = arith.constant 0 : index
    %c0_4 = arith.constant 0 : index
    %3 = vector.load %arg3[%c0_3, %c0_4] : memref<1x32xf32, #tpu.memory_space<vmem>>, vector<1x32xf32>
    %4 = vector.broadcast %3 : vector<1x32xf32> to vector<16x32xf32>
    %5 = arith.addf %2, %4 : vector<16x32xf32>
    %6 = arith.truncf %5 : vector<16x32xf32> to vector<16x32xbf16>
    %c0_5 = arith.constant 0 : index
    %c0_6 = arith.constant 0 : index
    %7 = vector.load %arg4[%c0_5, %c0_6] : memref<16x32xbf16, #tpu.memory_space<vmem>>, vector<16x32xbf16>
    tpu.vector_store %arg4[%c0_5, %c0_6], %6 {strides = array<i32>} : memref<16x32xbf16, #tpu.memory_space<vmem>>, vector<16x32xbf16>,
    return
  }
  func.func @transform_0(%arg0: i32) -> (i32, i32) {
    %c0_i32 = arith.constant 0 : i32
    %c0_i32_0 = arith.constant 0 : i32
    return %arg0, %c0_i32 : i32, i32
  }
  func.func @transform_1(%arg0: i32) -> (i32, i32) {
    %c0_i32 = arith.constant 0 : i32
    %c0_i32_0 = arith.constant 0 : i32
    %c0_i32_1 = arith.constant 0 : i32
    return %c0_i32, %c0_i32_0 : i32, i32
  }
  func.func @transform_2(%arg0: i32) -> (i32, i32) {
    %c0_i32 = arith.constant 0 : i32
    %c0_i32_0 = arith.constant 0 : i32
    %c0_i32_1 = arith.constant 0 : i32
    return %c0_i32, %c0_i32_0 : i32, i32
  }
  func.func @transform_3(%arg0: i32) -> (i32, i32) {
    %c0_i32 = arith.constant 0 : i32
    %c0_i32_0 = arith.constant 0 : i32
    return %arg0, %c0_i32 : i32, i32
  }
}

module attributes {stable_mosaic.version = 11 : i64} {
  func.func @_attn_slab_kernel(%arg0: i32, %arg1: memref<1x8x96xbf16, #tpu.memory_space<vmem>>, %arg2: memref<1x1x8xf32, #tpu.memory_space<vmem>>, %arg3: memref<1x8x32xbf16, #tpu.memory_space<vmem>>) attributes {dimension_semantics = [#tpu.dimension_semantics<parallel>], iteration_bounds = array<i64: 2>, scalar_prefetch = 0 : i64, scratch_operands = 0 : i64, tpu.core_type = #tpu.core_type<tc>, window_params = [{transform_indices = @transform_0, window_bounds = array<i64: 1, 8, 96>}, {transform_indices = @transform_1, window_bounds = array<i64: 1, 1, 8>}, {transform_indices = @transform_2, window_bounds = array<i64: 1, 8, 32>}]} {
    %c0 = arith.constant 0 : index
    %c0_0 = arith.constant 0 : index
    %c0_1 = arith.constant 0 : index
    %0 = vector.load %arg1[%c0, %c0_0, %c0_1] : memref<1x8x96xbf16, #tpu.memory_space<vmem>>, vector<1x8x96xbf16>
    %1 = vector.shape_cast %0 : vector<1x8x96xbf16> to vector<8x96xbf16>
    %2 = vector.extract_strided_slice %1 {offsets = [0, 0], sizes = [8, 32], strides = [1, 1]} : vector<8x96xbf16> to vector<8x32xbf16>
    %3 = vector.extract_strided_slice %1 {offsets = [0, 32], sizes = [8, 32], strides = [1, 1]} : vector<8x96xbf16> to vector<8x32xbf16>
    %4 = vector.extract_strided_slice %1 {offsets = [0, 64], sizes = [8, 32], strides = [1, 1]} : vector<8x96xbf16> to vector<8x32xbf16>
    %c0_2 = arith.constant 0 : index
    %c0_3 = arith.constant 0 : index
    %c0_4 = arith.constant 0 : index
    %5 = vector.load %arg2[%c0_2, %c0_3, %c0_4] : memref<1x1x8xf32, #tpu.memory_space<vmem>>, vector<1x1x8xf32>
    %6 = vector.shape_cast %5 : vector<1x1x8xf32> to vector<1x8xf32>
    %7 = vector.extract_strided_slice %2 {offsets = [0, 0], sizes = [8, 8], strides = [1, 1]} : vector<8x32xbf16> to vector<8x8xbf16>
    %cst = arith.constant 3.535160e-01 : bf16
    %8 = vector.broadcast %cst : bf16 to vector<8x8xbf16>
    %9 = arith.mulf %7, %8 : vector<8x8xbf16>
    %10 = vector.extract_strided_slice %3 {offsets = [0, 0], sizes = [8, 8], strides = [1, 1]} : vector<8x32xbf16> to vector<8x8xbf16>
    "tpu.trace_start"() <{level = 10 : i32, message = "qd,kd->qk"}> : () -> ()
    %cst_5 = arith.constant dense<0.000000e+00> : vector<8x8xf32>
    %11 = tpu.matmul %9, %10, %cst_5 {dimension_numbers = #tpu.dot_dimension_numbers<[1], [1], [0], [0], [0, 0, 1, 0], [], []>} : vector<8x8xbf16>, vector<8x8xbf16>, vector<8x8xf32> -> vector<8x8xf32>
    "tpu.trace_stop"() : () -> ()
    %12 = vector.broadcast %6 : vector<1x8xf32> to vector<8x8xf32>
    %13 = arith.addf %11, %12 : vector<8x8xf32>
    %cst_6 = arith.constant dense<0xFF800000> : vector<8xf32>
    %14 = vector.multi_reduction <maximumf>, %13, %cst_6 [1] : vector<8x8xf32> to vector<8xf32>
    %15 = vector.shape_cast %14 : vector<8xf32> to vector<8x1xf32>
    %16 = vector.broadcast %15 : vector<8x1xf32> to vector<8x8xf32>
    %17 = arith.subf %13, %16 : vector<8x8xf32>
    %18 = math.exp %17 : vector<8x8xf32>
    %cst_7 = arith.constant dense<0.000000e+00> : vector<8xf32>
    %19 = vector.multi_reduction <add>, %18, %cst_7 [1] : vector<8x8xf32> to vector<8xf32>
    %20 = vector.shape_cast %19 : vector<8xf32> to vector<8x1xf32>
    %21 = tpu.reciprocal %20 {approx = true} : vector<8x1xf32> -> vector<8x1xf32>
    %22 = vector.broadcast %21 : vector<8x1xf32> to vector<8x8xf32>
    %23 = arith.mulf %18, %22 : vector<8x8xf32>
    %24 = arith.truncf %23 : vector<8x8xf32> to vector<8x8xbf16>
    %25 = vector.extract_strided_slice %4 {offsets = [0, 0], sizes = [8, 8], strides = [1, 1]} : vector<8x32xbf16> to vector<8x8xbf16>
    "tpu.trace_start"() <{level = 10 : i32, message = "qk,kd->qd"}> : () -> ()
    %cst_8 = arith.constant dense<0.000000e+00> : vector<8x8xf32>
    %26 = tpu.matmul %24, %25, %cst_8 {dimension_numbers = #tpu.dot_dimension_numbers<[1], [0], [0], [1], [0, 0, 1, 1], [], []>} : vector<8x8xbf16>, vector<8x8xbf16>, vector<8x8xf32> -> vector<8x8xf32>
    "tpu.trace_stop"() : () -> ()
    %27 = vector.extract_strided_slice %2 {offsets = [0, 8], sizes = [8, 8], strides = [1, 1]} : vector<8x32xbf16> to vector<8x8xbf16>
    %cst_9 = arith.constant 3.535160e-01 : bf16
    %28 = vector.broadcast %cst_9 : bf16 to vector<8x8xbf16>
    %29 = arith.mulf %27, %28 : vector<8x8xbf16>
    %30 = vector.extract_strided_slice %3 {offsets = [0, 8], sizes = [8, 8], strides = [1, 1]} : vector<8x32xbf16> to vector<8x8xbf16>
    "tpu.trace_start"() <{level = 10 : i32, message = "qd,kd->qk"}> : () -> ()
    %cst_10 = arith.constant dense<0.000000e+00> : vector<8x8xf32>
    %31 = tpu.matmul %29, %30, %cst_10 {dimension_numbers = #tpu.dot_dimension_numbers<[1], [1], [0], [0], [0, 0, 1, 0], [], []>} : vector<8x8xbf16>, vector<8x8xbf16>, vector<8x8xf32> -> vector<8x8xf32>
    "tpu.trace_stop"() : () -> ()
    %32 = vector.broadcast %6 : vector<1x8xf32> to vector<8x8xf32>
    %33 = arith.addf %31, %32 : vector<8x8xf32>
    %cst_11 = arith.constant dense<0xFF800000> : vector<8xf32>
    %34 = vector.multi_reduction <maximumf>, %33, %cst_11 [1] : vector<8x8xf32> to vector<8xf32>
    %35 = vector.shape_cast %34 : vector<8xf32> to vector<8x1xf32>
    %36 = vector.broadcast %35 : vector<8x1xf32> to vector<8x8xf32>
    %37 = arith.subf %33, %36 : vector<8x8xf32>
    %38 = math.exp %37 : vector<8x8xf32>
    %cst_12 = arith.constant dense<0.000000e+00> : vector<8xf32>
    %39 = vector.multi_reduction <add>, %38, %cst_12 [1] : vector<8x8xf32> to vector<8xf32>
    %40 = vector.shape_cast %39 : vector<8xf32> to vector<8x1xf32>
    %41 = tpu.reciprocal %40 {approx = true} : vector<8x1xf32> -> vector<8x1xf32>
    %42 = vector.broadcast %41 : vector<8x1xf32> to vector<8x8xf32>
    %43 = arith.mulf %38, %42 : vector<8x8xf32>
    %44 = arith.truncf %43 : vector<8x8xf32> to vector<8x8xbf16>
    %45 = vector.extract_strided_slice %4 {offsets = [0, 8], sizes = [8, 8], strides = [1, 1]} : vector<8x32xbf16> to vector<8x8xbf16>
    "tpu.trace_start"() <{level = 10 : i32, message = "qk,kd->qd"}> : () -> ()
    %cst_13 = arith.constant dense<0.000000e+00> : vector<8x8xf32>
    %46 = tpu.matmul %44, %45, %cst_13 {dimension_numbers = #tpu.dot_dimension_numbers<[1], [0], [0], [1], [0, 0, 1, 1], [], []>} : vector<8x8xbf16>, vector<8x8xbf16>, vector<8x8xf32> -> vector<8x8xf32>
    "tpu.trace_stop"() : () -> ()
    %47 = vector.extract_strided_slice %2 {offsets = [0, 16], sizes = [8, 8], strides = [1, 1]} : vector<8x32xbf16> to vector<8x8xbf16>
    %cst_14 = arith.constant 3.535160e-01 : bf16
    %48 = vector.broadcast %cst_14 : bf16 to vector<8x8xbf16>
    %49 = arith.mulf %47, %48 : vector<8x8xbf16>
    %50 = vector.extract_strided_slice %3 {offsets = [0, 16], sizes = [8, 8], strides = [1, 1]} : vector<8x32xbf16> to vector<8x8xbf16>
    "tpu.trace_start"() <{level = 10 : i32, message = "qd,kd->qk"}> : () -> ()
    %cst_15 = arith.constant dense<0.000000e+00> : vector<8x8xf32>
    %51 = tpu.matmul %49, %50, %cst_15 {dimension_numbers = #tpu.dot_dimension_numbers<[1], [1], [0], [0], [0, 0, 1, 0], [], []>} : vector<8x8xbf16>, vector<8x8xbf16>, vector<8x8xf32> -> vector<8x8xf32>
    "tpu.trace_stop"() : () -> ()
    %52 = vector.broadcast %6 : vector<1x8xf32> to vector<8x8xf32>
    %53 = arith.addf %51, %52 : vector<8x8xf32>
    %cst_16 = arith.constant dense<0xFF800000> : vector<8xf32>
    %54 = vector.multi_reduction <maximumf>, %53, %cst_16 [1] : vector<8x8xf32> to vector<8xf32>
    %55 = vector.shape_cast %54 : vector<8xf32> to vector<8x1xf32>
    %56 = vector.broadcast %55 : vector<8x1xf32> to vector<8x8xf32>
    %57 = arith.subf %53, %56 : vector<8x8xf32>
    %58 = math.exp %57 : vector<8x8xf32>
    %cst_17 = arith.constant dense<0.000000e+00> : vector<8xf32>
    %59 = vector.multi_reduction <add>, %58, %cst_17 [1] : vector<8x8xf32> to vector<8xf32>
    %60 = vector.shape_cast %59 : vector<8xf32> to vector<8x1xf32>
    %61 = tpu.reciprocal %60 {approx = true} : vector<8x1xf32> -> vector<8x1xf32>
    %62 = vector.broadcast %61 : vector<8x1xf32> to vector<8x8xf32>
    %63 = arith.mulf %58, %62 : vector<8x8xf32>
    %64 = arith.truncf %63 : vector<8x8xf32> to vector<8x8xbf16>
    %65 = vector.extract_strided_slice %4 {offsets = [0, 16], sizes = [8, 8], strides = [1, 1]} : vector<8x32xbf16> to vector<8x8xbf16>
    "tpu.trace_start"() <{level = 10 : i32, message = "qk,kd->qd"}> : () -> ()
    %cst_18 = arith.constant dense<0.000000e+00> : vector<8x8xf32>
    %66 = tpu.matmul %64, %65, %cst_18 {dimension_numbers = #tpu.dot_dimension_numbers<[1], [0], [0], [1], [0, 0, 1, 1], [], []>} : vector<8x8xbf16>, vector<8x8xbf16>, vector<8x8xf32> -> vector<8x8xf32>
    "tpu.trace_stop"() : () -> ()
    %67 = vector.extract_strided_slice %2 {offsets = [0, 24], sizes = [8, 8], strides = [1, 1]} : vector<8x32xbf16> to vector<8x8xbf16>
    %cst_19 = arith.constant 3.535160e-01 : bf16
    %68 = vector.broadcast %cst_19 : bf16 to vector<8x8xbf16>
    %69 = arith.mulf %67, %68 : vector<8x8xbf16>
    %70 = vector.extract_strided_slice %3 {offsets = [0, 24], sizes = [8, 8], strides = [1, 1]} : vector<8x32xbf16> to vector<8x8xbf16>
    "tpu.trace_start"() <{level = 10 : i32, message = "qd,kd->qk"}> : () -> ()
    %cst_20 = arith.constant dense<0.000000e+00> : vector<8x8xf32>
    %71 = tpu.matmul %69, %70, %cst_20 {dimension_numbers = #tpu.dot_dimension_numbers<[1], [1], [0], [0], [0, 0, 1, 0], [], []>} : vector<8x8xbf16>, vector<8x8xbf16>, vector<8x8xf32> -> vector<8x8xf32>
    "tpu.trace_stop"() : () -> ()
    %72 = vector.broadcast %6 : vector<1x8xf32> to vector<8x8xf32>
    %73 = arith.addf %71, %72 : vector<8x8xf32>
    %cst_21 = arith.constant dense<0xFF800000> : vector<8xf32>
    %74 = vector.multi_reduction <maximumf>, %73, %cst_21 [1] : vector<8x8xf32> to vector<8xf32>
    %75 = vector.shape_cast %74 : vector<8xf32> to vector<8x1xf32>
    %76 = vector.broadcast %75 : vector<8x1xf32> to vector<8x8xf32>
    %77 = arith.subf %73, %76 : vector<8x8xf32>
    %78 = math.exp %77 : vector<8x8xf32>
    %cst_22 = arith.constant dense<0.000000e+00> : vector<8xf32>
    %79 = vector.multi_reduction <add>, %78, %cst_22 [1] : vector<8x8xf32> to vector<8xf32>
    %80 = vector.shape_cast %79 : vector<8xf32> to vector<8x1xf32>
    %81 = tpu.reciprocal %80 {approx = true} : vector<8x1xf32> -> vector<8x1xf32>
    %82 = vector.broadcast %81 : vector<8x1xf32> to vector<8x8xf32>
    %83 = arith.mulf %78, %82 : vector<8x8xf32>
    %84 = arith.truncf %83 : vector<8x8xf32> to vector<8x8xbf16>
    %85 = vector.extract_strided_slice %4 {offsets = [0, 24], sizes = [8, 8], strides = [1, 1]} : vector<8x32xbf16> to vector<8x8xbf16>
    "tpu.trace_start"() <{level = 10 : i32, message = "qk,kd->qd"}> : () -> ()
    %cst_23 = arith.constant dense<0.000000e+00> : vector<8x8xf32>
    %86 = tpu.matmul %84, %85, %cst_23 {dimension_numbers = #tpu.dot_dimension_numbers<[1], [0], [0], [1], [0, 0, 1, 1], [], []>} : vector<8x8xbf16>, vector<8x8xbf16>, vector<8x8xf32> -> vector<8x8xf32>
    "tpu.trace_stop"() : () -> ()
    %87 = tpu.concatenate %26, %46, %66, %86 in 1 : vector<8x8xf32>, vector<8x8xf32>, vector<8x8xf32>, vector<8x8xf32> -> vector<8x32xf32>
    %88 = arith.truncf %87 : vector<8x32xf32> to vector<8x32xbf16>
    %c0_24 = arith.constant 0 : index
    %c0_25 = arith.constant 0 : index
    %c0_26 = arith.constant 0 : index
    %89 = vector.load %arg3[%c0_24, %c0_25, %c0_26] : memref<1x8x32xbf16, #tpu.memory_space<vmem>>, vector<1x8x32xbf16>
    %90 = vector.shape_cast %89 : vector<1x8x32xbf16> to vector<8x32xbf16>
    %91 = vector.shape_cast %88 : vector<8x32xbf16> to vector<1x8x32xbf16>
    tpu.vector_store %arg3[%c0_24, %c0_25, %c0_26], %91 {strides = array<i32>} : memref<1x8x32xbf16, #tpu.memory_space<vmem>>, vector<1x8x32xbf16>,
    return
  }
  func.func @transform_0(%arg0: i32) -> (i32, i32, i32) {
    %c0_i32 = arith.constant 0 : i32
    %c0_i32_0 = arith.constant 0 : i32
    %c0_i32_1 = arith.constant 0 : i32
    return %arg0, %c0_i32, %c0_i32_0 : i32, i32, i32
  }
  func.func @transform_1(%arg0: i32) -> (i32, i32, i32) {
    %c0_i32 = arith.constant 0 : i32
    %c0_i32_0 = arith.constant 0 : i32
    %c0_i32_1 = arith.constant 0 : i32
    return %arg0, %c0_i32, %c0_i32_0 : i32, i32, i32
  }
  func.func @transform_2(%arg0: i32) -> (i32, i32, i32) {
    %c0_i32 = arith.constant 0 : i32
    %c0_i32_0 = arith.constant 0 : i32
    %c0_i32_1 = arith.constant 0 : i32
    return %arg0, %c0_i32, %c0_i32_0 : i32, i32, i32
  }
}

module attributes {stable_mosaic.version = 11 : i64} {
  func.func @_linear_kernel(%arg0: i32, %arg1: memref<16x32xbf16, #tpu.memory_space<vmem>>, %arg2: memref<32x64xbf16, #tpu.memory_space<vmem>>, %arg3: memref<1x64xf32, #tpu.memory_space<vmem>>, %arg4: memref<16x64xbf16, #tpu.memory_space<vmem>>) attributes {dimension_semantics = [#tpu.dimension_semantics<parallel>], iteration_bounds = array<i64: 1>, scalar_prefetch = 0 : i64, scratch_operands = 0 : i64, tpu.core_type = #tpu.core_type<tc>, window_params = [{transform_indices = @transform_0, window_bounds = array<i64: 16, 32>}, {pipeline_mode = #tpu.pipeline_mode<synchronous>, transform_indices = @transform_1, window_bounds = array<i64: 32, 64>}, {pipeline_mode = #tpu.pipeline_mode<synchronous>, transform_indices = @transform_2, window_bounds = array<i64: 1, 64>}, {transform_indices = @transform_3, window_bounds = array<i64: 16, 64>}]} {
    %c0 = arith.constant 0 : index
    %c0_0 = arith.constant 0 : index
    %0 = vector.load %arg1[%c0, %c0_0] : memref<16x32xbf16, #tpu.memory_space<vmem>>, vector<16x32xbf16>
    %c0_1 = arith.constant 0 : index
    %c0_2 = arith.constant 0 : index
    %1 = vector.load %arg2[%c0_1, %c0_2] : memref<32x64xbf16, #tpu.memory_space<vmem>>, vector<32x64xbf16>
    %cst = arith.constant dense<0.000000e+00> : vector<16x64xf32>
    %2 = tpu.matmul %0, %1, %cst {dimension_numbers = #tpu.dot_dimension_numbers<[1], [0], [0], [1], [0, 0, 1, 1], [], []>} : vector<16x32xbf16>, vector<32x64xbf16>, vector<16x64xf32> -> vector<16x64xf32>
    %c0_3 = arith.constant 0 : index
    %c0_4 = arith.constant 0 : index
    %3 = vector.load %arg3[%c0_3, %c0_4] : memref<1x64xf32, #tpu.memory_space<vmem>>, vector<1x64xf32>
    %4 = vector.broadcast %3 : vector<1x64xf32> to vector<16x64xf32>
    %5 = arith.addf %2, %4 : vector<16x64xf32>
    %6 = arith.mulf %5, %5 : vector<16x64xf32>
    %7 = arith.mulf %5, %6 : vector<16x64xf32>
    %cst_5 = arith.constant 4.471500e-02 : f32
    %8 = vector.broadcast %cst_5 : f32 to vector<16x64xf32>
    %9 = arith.mulf %8, %7 : vector<16x64xf32>
    %10 = arith.addf %5, %9 : vector<16x64xf32>
    %cst_6 = arith.constant 0.797884583 : f32
    %11 = vector.broadcast %cst_6 : f32 to vector<16x64xf32>
    %12 = arith.mulf %11, %10 : vector<16x64xf32>
    %13 = math.tanh %12 : vector<16x64xf32>
    %cst_7 = arith.constant 1.000000e+00 : f32
    %14 = vector.broadcast %cst_7 : f32 to vector<16x64xf32>
    %15 = arith.addf %14, %13 : vector<16x64xf32>
    %cst_8 = arith.constant 5.000000e-01 : f32
    %16 = vector.broadcast %cst_8 : f32 to vector<16x64xf32>
    %17 = arith.mulf %16, %15 : vector<16x64xf32>
    %18 = arith.mulf %5, %17 : vector<16x64xf32>
    %19 = arith.truncf %18 : vector<16x64xf32> to vector<16x64xbf16>
    %c0_9 = arith.constant 0 : index
    %c0_10 = arith.constant 0 : index
    %20 = vector.load %arg4[%c0_9, %c0_10] : memref<16x64xbf16, #tpu.memory_space<vmem>>, vector<16x64xbf16>
    tpu.vector_store %arg4[%c0_9, %c0_10], %19 {strides = array<i32>} : memref<16x64xbf16, #tpu.memory_space<vmem>>, vector<16x64xbf16>,
    return
  }
  func.func @transform_0(%arg0: i32) -> (i32, i32) {
    %c0_i32 = arith.constant 0 : i32
    %c0_i32_0 = arith.constant 0 : i32
    return %arg0, %c0_i32 : i32, i32
  }
  func.func @transform_1(%arg0: i32) -> (i32, i32) {
    %c0_i32 = arith.constant 0 : i32
    %c0_i32_0 = arith.constant 0 : i32
    %c0_i32_1 = arith.constant 0 : i32
    return %c0_i32, %c0_i32_0 : i32, i32
  }
  func.func @transform_2(%arg0: i32) -> (i32, i32) {
    %c0_i32 = arith.constant 0 : i32
    %c0_i32_0 = arith.constant 0 : i32
    %c0_i32_1 = arith.constant 0 : i32
    return %c0_i32, %c0_i32_0 : i32, i32
  }
  func.func @transform_3(%arg0: i32) -> (i32, i32) {
    %c0_i32 = arith.constant 0 : i32
    %c0_i32_0 = arith.constant 0 : i32
    return %arg0, %c0_i32 : i32, i32
  }
}

module attributes {stable_mosaic.version = 11 : i64} {
  func.func @_add_ln_kernel(%arg0: i32, %arg1: memref<16x32xbf16, #tpu.memory_space<vmem>>, %arg2: memref<16x32xbf16, #tpu.memory_space<vmem>>, %arg3: memref<1x32xf32, #tpu.memory_space<vmem>>, %arg4: memref<1x32xf32, #tpu.memory_space<vmem>>, %arg5: memref<16x32xbf16, #tpu.memory_space<vmem>>) attributes {dimension_semantics = [#tpu.dimension_semantics<parallel>], iteration_bounds = array<i64: 1>, scalar_prefetch = 0 : i64, scratch_operands = 0 : i64, tpu.core_type = #tpu.core_type<tc>, window_params = [{transform_indices = @transform_0, window_bounds = array<i64: 16, 32>}, {transform_indices = @transform_1, window_bounds = array<i64: 16, 32>}, {pipeline_mode = #tpu.pipeline_mode<synchronous>, transform_indices = @transform_2, window_bounds = array<i64: 1, 32>}, {pipeline_mode = #tpu.pipeline_mode<synchronous>, transform_indices = @transform_3, window_bounds = array<i64: 1, 32>}, {transform_indices = @transform_4, window_bounds = array<i64: 16, 32>}]} {
    %c0 = arith.constant 0 : index
    %c0_0 = arith.constant 0 : index
    %0 = vector.load %arg1[%c0, %c0_0] : memref<16x32xbf16, #tpu.memory_space<vmem>>, vector<16x32xbf16>
    %1 = arith.extf %0 : vector<16x32xbf16> to vector<16x32xf32>
    %c0_1 = arith.constant 0 : index
    %c0_2 = arith.constant 0 : index
    %2 = vector.load %arg2[%c0_1, %c0_2] : memref<16x32xbf16, #tpu.memory_space<vmem>>, vector<16x32xbf16>
    %3 = arith.extf %2 : vector<16x32xbf16> to vector<16x32xf32>
    %4 = arith.addf %1, %3 : vector<16x32xf32>
    %cst = arith.constant dense<0.000000e+00> : vector<16xf32>
    %5 = vector.multi_reduction <add>, %4, %cst [1] : vector<16x32xf32> to vector<16xf32>
    %6 = vector.shape_cast %5 : vector<16xf32> to vector<16x1xf32>
    %cst_3 = arith.constant 3.200000e+01 : f32
    %7 = vector.broadcast %cst_3 : f32 to vector<16x1xf32>
    %8 = arith.divf %6, %7 : vector<16x1xf32>
    %9 = arith.mulf %4, %4 : vector<16x32xf32>
    %cst_4 = arith.constant dense<0.000000e+00> : vector<16xf32>
    %10 = vector.multi_reduction <add>, %9, %cst_4 [1] : vector<16x32xf32> to vector<16xf32>
    %11 = vector.shape_cast %10 : vector<16xf32> to vector<16x1xf32>
    %cst_5 = arith.constant 3.200000e+01 : f32
    %12 = vector.broadcast %cst_5 : f32 to vector<16x1xf32>
    %13 = arith.divf %11, %12 : vector<16x1xf32>
    %14 = arith.mulf %8, %8 : vector<16x1xf32>
    %15 = arith.subf %13, %14 : vector<16x1xf32>
    %cst_6 = arith.constant 0.000000e+00 : f32
    %16 = vector.broadcast %cst_6 : f32 to vector<16x1xf32>
    %17 = arith.maximumf %15, %16 : vector<16x1xf32>
    %18 = vector.broadcast %8 : vector<16x1xf32> to vector<16x32xf32>
    %19 = arith.subf %4, %18 : vector<16x32xf32>
    %cst_7 = arith.constant 9.99999996E-13 : f32
    %20 = vector.broadcast %cst_7 : f32 to vector<16x1xf32>
    %21 = arith.addf %17, %20 : vector<16x1xf32>
    %22 = math.rsqrt %21 : vector<16x1xf32>
    %23 = vector.broadcast %22 : vector<16x1xf32> to vector<16x32xf32>
    %24 = arith.mulf %19, %23 : vector<16x32xf32>
    %c0_8 = arith.constant 0 : index
    %c0_9 = arith.constant 0 : index
    %25 = vector.load %arg3[%c0_8, %c0_9] : memref<1x32xf32, #tpu.memory_space<vmem>>, vector<1x32xf32>
    %26 = vector.broadcast %25 : vector<1x32xf32> to vector<16x32xf32>
    %27 = arith.mulf %24, %26 : vector<16x32xf32>
    %c0_10 = arith.constant 0 : index
    %c0_11 = arith.constant 0 : index
    %28 = vector.load %arg4[%c0_10, %c0_11] : memref<1x32xf32, #tpu.memory_space<vmem>>, vector<1x32xf32>
    %29 = vector.broadcast %28 : vector<1x32xf32> to vector<16x32xf32>
    %30 = arith.addf %27, %29 : vector<16x32xf32>
    %31 = arith.truncf %30 : vector<16x32xf32> to vector<16x32xbf16>
    %c0_12 = arith.constant 0 : index
    %c0_13 = arith.constant 0 : index
    %32 = vector.load %arg5[%c0_12, %c0_13] : memref<16x32xbf16, #tpu.memory_space<vmem>>, vector<16x32xbf16>
    tpu.vector_store %arg5[%c0_12, %c0_13], %31 {strides = array<i32>} : memref<16x32xbf16, #tpu.memory_space<vmem>>, vector<16x32xbf16>,
    return
  }
  func.func @transform_0(%arg0: i32) -> (i32, i32) {
    %c0_i32 = arith.constant 0 : i32
    %c0_i32_0 = arith.constant 0 : i32
    return %arg0, %c0_i32 : i32, i32
  }
  func.func @transform_1(%arg0: i32) -> (i32, i32) {
    %c0_i32 = arith.constant 0 : i32
    %c0_i32_0 = arith.constant 0 : i32
    return %arg0, %c0_i32 : i32, i32
  }
  func.func @transform_2(%arg0: i32) -> (i32, i32) {
    %c0_i32 = arith.constant 0 : i32
    %c0_i32_0 = arith.constant 0 : i32
    %c0_i32_1 = arith.constant 0 : i32
    return %c0_i32, %c0_i32_0 : i32, i32
  }
  func.func @transform_3(%arg0: i32) -> (i32, i32) {
    %c0_i32 = arith.constant 0 : i32
    %c0_i32_0 = arith.constant 0 : i32
    %c0_i32_1 = arith.constant 0 : i32
    return %c0_i32, %c0_i32_0 : i32, i32
  }
  func.func @transform_4(%arg0: i32) -> (i32, i32) {
    %c0_i32 = arith.constant 0 : i32
    %c0_i32_0 = arith.constant 0 : i32
    return %arg0, %c0_i32 : i32, i32
  }
}

module attributes {stable_mosaic.version = 11 : i64} {
  func.func @_linear_kernel(%arg0: i32, %arg1: memref<16x64xbf16, #tpu.memory_space<vmem>>, %arg2: memref<64x32xbf16, #tpu.memory_space<vmem>>, %arg3: memref<1x32xf32, #tpu.memory_space<vmem>>, %arg4: memref<16x32xbf16, #tpu.memory_space<vmem>>) attributes {dimension_semantics = [#tpu.dimension_semantics<parallel>], iteration_bounds = array<i64: 1>, scalar_prefetch = 0 : i64, scratch_operands = 0 : i64, tpu.core_type = #tpu.core_type<tc>, window_params = [{transform_indices = @transform_0, window_bounds = array<i64: 16, 64>}, {pipeline_mode = #tpu.pipeline_mode<synchronous>, transform_indices = @transform_1, window_bounds = array<i64: 64, 32>}, {pipeline_mode = #tpu.pipeline_mode<synchronous>, transform_indices = @transform_2, window_bounds = array<i64: 1, 32>}, {transform_indices = @transform_3, window_bounds = array<i64: 16, 32>}]} {
    %c0 = arith.constant 0 : index
    %c0_0 = arith.constant 0 : index
    %0 = vector.load %arg1[%c0, %c0_0] : memref<16x64xbf16, #tpu.memory_space<vmem>>, vector<16x64xbf16>
    %c0_1 = arith.constant 0 : index
    %c0_2 = arith.constant 0 : index
    %1 = vector.load %arg2[%c0_1, %c0_2] : memref<64x32xbf16, #tpu.memory_space<vmem>>, vector<64x32xbf16>
    %cst = arith.constant dense<0.000000e+00> : vector<16x32xf32>
    %2 = tpu.matmul %0, %1, %cst {dimension_numbers = #tpu.dot_dimension_numbers<[1], [0], [0], [1], [0, 0, 1, 1], [], []>} : vector<16x64xbf16>, vector<64x32xbf16>, vector<16x32xf32> -> vector<16x32xf32>
    %c0_3 = arith.constant 0 : index
    %c0_4 = arith.constant 0 : index
    %3 = vector.load %arg3[%c0_3, %c0_4] : memref<1x32xf32, #tpu.memory_space<vmem>>, vector<1x32xf32>
    %4 = vector.broadcast %3 : vector<1x32xf32> to vector<16x32xf32>
    %5 = arith.addf %2, %4 : vector<16x32xf32>
    %6 = arith.truncf %5 : vector<16x32xf32> to vector<16x32xbf16>
    %c0_5 = arith.constant 0 : index
    %c0_6 = arith.constant 0 : index
    %7 = vector.load %arg4[%c0_5, %c0_6] : memref<16x32xbf16, #tpu.memory_space<vmem>>, vector<16x32xbf16>
    tpu.vector_store %arg4[%c0_5, %c0_6], %6 {strides = array<i32>} : memref<16x32xbf16, #tpu.memory_space<vmem>>, vector<16x32xbf16>,
    return
  }
  func.func @transform_0(%arg0: i32) -> (i32, i32) {
    %c0_i32 = arith.constant 0 : i32
    %c0_i32_0 = arith.constant 0 : i32
    return %arg0, %c0_i32 : i32, i32
  }
  func.func @transform_1(%arg0: i32) -> (i32, i32) {
    %c0_i32 = arith.constant 0 : i32
    %c0_i32_0 = arith.constant 0 : i32
    %c0_i32_1 = arith.constant 0 : i32
    return %c0_i32, %c0_i32_0 : i32, i32
  }
  func.func @transform_2(%arg0: i32) -> (i32, i32) {
    %c0_i32 = arith.constant 0 : i32
    %c0_i32_0 = arith.constant 0 : i32
    %c0_i32_1 = arith.constant 0 : i32
    return %c0_i32, %c0_i32_0 : i32, i32
  }
  func.func @transform_3(%arg0: i32) -> (i32, i32) {
    %c0_i32 = arith.constant 0 : i32
    %c0_i32_0 = arith.constant 0 : i32
    return %arg0, %c0_i32 : i32, i32
  }
}

module attributes {stable_mosaic.version = 11 : i64} {
  func.func @_proj_mse_kernel(%arg0: memref<2x32xbf16, #tpu.memory_space<vmem>>, %arg1: memref<32x16xf32, #tpu.memory_space<vmem>>, %arg2: memref<2x16xf32, #tpu.memory_space<vmem>>, %arg3: memref<1x1xf32, #tpu.memory_space<smem>>) attributes {dimension_semantics = [], scalar_prefetch = 0 : i64, scratch_operands = 0 : i64, tpu.core_type = #tpu.core_type<tc>} {
    %c0 = arith.constant 0 : index
    %c0_0 = arith.constant 0 : index
    %0 = vector.load %arg0[%c0, %c0_0] : memref<2x32xbf16, #tpu.memory_space<vmem>>, vector<2x32xbf16>
    %1 = arith.extf %0 : vector<2x32xbf16> to vector<2x32xf32>
    %c0_1 = arith.constant 0 : index
    %c0_2 = arith.constant 0 : index
    %2 = vector.load %arg1[%c0_1, %c0_2] : memref<32x16xf32, #tpu.memory_space<vmem>>, vector<32x16xf32>
    %cst = arith.constant dense<0.000000e+00> : vector<2x16xf32>
    %3 = tpu.matmul %1, %2, %cst {dimension_numbers = #tpu.dot_dimension_numbers<[1], [0], [0], [1], [0, 0, 1, 1], [], []>} : vector<2x32xf32>, vector<32x16xf32>, vector<2x16xf32> -> vector<2x16xf32>
    %c0_3 = arith.constant 0 : index
    %c0_4 = arith.constant 0 : index
    %4 = vector.load %arg2[%c0_3, %c0_4] : memref<2x16xf32, #tpu.memory_space<vmem>>, vector<2x16xf32>
    %5 = arith.subf %3, %4 : vector<2x16xf32>
    %6 = arith.mulf %5, %5 : vector<2x16xf32>
    %7 = vector.shape_cast %6 : vector<2x16xf32> to vector<1x2x16xf32>
    %cst_5 = arith.constant dense<0.000000e+00> : vector<1xf32>
    %8 = vector.multi_reduction <add>, %7, %cst_5 [1, 2] : vector<1x2x16xf32> to vector<1xf32>
    %9 = vector.shape_cast %8 : vector<1xf32> to vector<1x1x1xf32>
    %10 = vector.extract %9[0, 0, 0] : f32 from vector<1x1x1xf32>
    %cst_6 = arith.constant 3.200000e+01 : f32
    %11 = arith.divf %10, %cst_6 : f32
    %c0_7 = arith.constant 0 : index
    %c0_8 = arith.constant 0 : index
    %12 = memref.load %arg3[%c0_7, %c0_8] : memref<1x1xf32, #tpu.memory_space<smem>>
    memref.store %11, %arg3[%c0_7, %c0_8] : memref<1x1xf32, #tpu.memory_space<smem>>
    return
  }
}

</mosaic_0001>

<bundles_post_ra>
// kernel: gs_distilled_forward.17
= control target key start
LH: loop header
LB: loop body
LE: loop exit
PB: predicated region body
PF: predicated region fallthrough
CT: control target
= control target key end

     0   :  { %vm42_vm0 = vcmask 261120   ;;  %vm62_vm1 = vcmask 781312   ;;  %s124_s1 = inlined_call_operand.vmem [shape: bf16[32,96], index: 1, kind: input, shape index: {}]   ;;  %s125_s2 = inlined_call_operand.vmem [shape: f32[1,96], index: 2, kind: input, shape index: {}]   ;;  %s126_s0 = inlined_call_operand.vmem [shape: bf16[16,32], index: 0, kind: input, shape index: {}]   ;;  %s127_s3 = inlined_call_operand.vmem [shape: bf16[16,96], index: 3, kind: output, shape index: {}]  }
   0x1   :  { %v84_v0 = vld [vmem:[%s124_s1 + $0x8] sm:$0xff]  ;;  %v83_v1 = vld [vmem:[%s124_s1] sm:$0xff] }
   0x2   :  { %52 = vmatpush.bf16.msra.mxu0 %v84_v0  ;;  %v82_v2 = vld [vmem:[%s126_s0] sm:$0xff] }
   0x3   :  { %v85_v3 = vld [vmem:[%s125_s2] ss:$0 sm:$0xff] }
   0x6   :  { %53 = vmatpush.bf16.msra.mxu0 %v83_v1 }
   0x9   :  { %81 = vmatmul.msk.bf16.vlgmr.msra.gmra.mxu0 %vm42_vm0, %v82_v2 }
  0x86   :  { %v55_v4 = vpop.f32.mrf.mxu0 }
  0x87   :  { %v56_v5 = vadd.f32 %v85_v3, %v55_v4 }
  0x89   :  { %v60_v6 = vpack.c.bf16 %v56_v5, %v56_v5 }
  0x8b   :  { %63 = vst.msk [vmem:[%s127_s3] sm:$0xf] %vm62_vm1, %v60_v6 }
  0x8e   :  { %v57_v7 = vpop.f32.mrf.mxu0 }
  0x8f   :  { %v58_v8 = vadd.f32 %v85_v3, %v57_v7 }
  0x91   :  { %v61_v9 = vpack.c.bf16 %v58_v8, %v58_v8 }
  0x93   :  { %64 = vst.msk [vmem:[%s127_s3 + $0x4] sm:$0xf] %vm62_vm1, %v61_v9 }

// kernel: gs_distilled_forward.16
= control target key start
LH: loop header
LB: loop body
LE: loop exit
PB: predicated region body
PF: predicated region fallthrough
CT: control target
= control target key end

     0   :  { %vm16_vm0 = vcmask 261120   ;;  %v104_v8 = vmov 32.0   ;;  %vm88_vm6 = vcmask 257024   ;;  %s149_s0 = inlined_call_operand.vmem [shape: f32[16,32], index: 0, kind: input, shape index: {}]   ;;  %s150_s1 = inlined_call_operand.vmem [shape: f32[1,32], index: 1, kind: input, shape index: {}]   ;;  %s151_s2 = inlined_call_operand.vmem [shape: f32[1,32], index: 2, kind: input, shape index: {}]   ;;  %s152_s3 = inlined_call_operand.vmem [shape: bf16[16,32], index: 3, kind: output, shape index: {}]  }
   0x1   :  { %v14_v0 = vld [vmem:[%s149_s0] sm:$0xff]  ;;  %v131_v3 = vld [vmem:[%s149_s0 + $0x8] sm:$0xff]  ;;  %98 = vrcp.f32 %v104_v8 }
   0x2   :  { %v17_v1 = vsel %vm16_vm0, %v14_v0, 0.0  ;;  %v32_v2 = vmul.f32 %v14_v0, %v14_v0  ;;  %v33_v5 = vmul.f32 %v131_v3, %v131_v3  ;;  %v20_v6 = vsel %vm16_vm0, %v131_v3, 0.0  ;;  %v96_v39 = vld [vmem:[%s150_s1] ss:$0 sm:$0xff] }
   0x3   :  { %18 = vadd.xlane.f32.xlu0 %v17_v1  ;;  %v97_v42 = vld [vmem:[%s151_s2] ss:$0 sm:$0xff] }
   0x4   :  { %v34_v4 = vsel %vm16_vm0, %v32_v2, 0.0  ;;  %v37_v7 = vsel %vm16_vm0, %v33_v5, 0.0 }
   0x5   :  { %35 = vadd.xlane.f32.xlu1 %v34_v4 }
   0x7   :  { %v99_v9 = vpop.eup %98 }
   0x8   :  { %v24_v10 = vmul.f32 32.0, %v99_v9  ;;  %vm28_vm1 = vweird.f32 %v99_v9 }
   0xa   :  { %v25_v11 = vsub.f32 1.0, %v24_v10 }
   0xb   :  { %21 = vadd.xlane.f32.xlu0 %v20_v6 }
   0xc   :  { %v26_v12 = vmul.f32 %v99_v9, %v25_v11 }
   0xd   :  { %38 = vadd.xlane.f32.xlu1 %v37_v7 }
   0xe   :  { %v27_v13 = vadd.f32 %v99_v9, %v26_v12 }
  0x10   :  { %v29_v14 = vsel %vm28_vm1, %v99_v9, %v27_v13 }
  0x76   :  { %v19_v15 = vpop.xlane.xlu0 %18 }
  0x77   :  { %v30_v16 = vmul.f32 %v29_v14, %v19_v15 }
  0x78   :  { %v36_v17 = vpop.xlane.xlu1 %35 }
  0x79   :  { %v42_v18 = vmul.f32 %v30_v16, %v30_v16  ;;  %v40_v19 = vmul.f32 %v36_v17, %v29_v14  ;;  %v48_v38 = vsub.f32 %v14_v0, %v30_v16 }
  0x7b   :  { %v44_v20 = vsub.f32 %v40_v19, %v42_v18 }
  0x7d   :  { %v46_v21 = vmax.f32 %v44_v20, 0.0 }
  0x7e   :  { %v22_v22 = vpop.xlane.xlu0 %21 }
  0x7f   :  { %v50_v23 = vadd.f32 1e-12, %v46_v21  ;;  %v31_v24 = vmul.f32 %v29_v14, %v22_v22 }
  0x80   :  { %v39_v25 = vpop.xlane.xlu1 %38 }
  0x81   :  { %100 = vrsqrt.f32 %v50_v23  ;;  %v43_v26 = vmul.f32 %v31_v24, %v31_v24  ;;  %v41_v27 = vmul.f32 %v39_v25, %v29_v14  ;;  %vm58_vm3 = vweird.f32 %v50_v23 }
  0x82   :  { %v49_v51 = vsub.f32 %v131_v3, %v31_v24 }
  0x83   :  { %v45_v28 = vsub.f32 %v41_v27, %v43_v26 }
  0x85   :  { %v47_v29 = vmax.f32 %v45_v28, 0.0 }
  0x87   :  { %v101_v30 = vpop.eup %100  ;;  %v51_v32 = vadd.f32 1e-12, %v47_v29 }
  0x88   :  { %v53_v31 = vmul.f32 %v101_v30, %v50_v23  ;;  %vm59_vm2 = vweird.f32 %v101_v30 }
  0x89   :  { %102 = vrsqrt.f32 %v51_v32  ;;  %vm60_vm4 = vmor %vm58_vm3, %vm59_vm2  ;;  %vm68_vm7 = vweird.f32 %v51_v32 }
  0x8a   :  { %v54_v33 = vmul.f32 %v101_v30, %v53_v31 }
  0x8c   :  { %v55_v34 = vmul.f32 0.5, %v54_v33 }
  0x8e   :  { %v56_v35 = vsub.f32 1.5, %v55_v34 }
  0x8f   :  { %v103_v36 = vpop.eup %102 }
  0x90   :  { %v57_v37 = vmul.f32 %v101_v30, %v56_v35  ;;  %v63_v40 = vmul.f32 %v103_v36, %v51_v32  ;;  %vm69_vm5 = vweird.f32 %v103_v36 }
  0x91   :  { %vm70_vm8 = vmor %vm68_vm7, %vm69_vm5 }
  0x92   :  { %v61_v41 = vsel %vm60_vm4, %v101_v30, %v57_v37  ;;  %v64_v44 = vmul.f32 %v103_v36, %v63_v40 }
  0x93   :  { %v72_v43 = vmul.f32 %v61_v41, %v48_v38 }
  0x94   :  { %v65_v46 = vmul.f32 0.5, %v64_v44 }
  0x95   :  { %v78_v45 = vmul.f32 %v96_v39, %v72_v43 }
  0x96   :  { %v66_v48 = vsub.f32 1.5, %v65_v46 }
  0x97   :  { %v84_v47 = vadd.f32 %v97_v42, %v78_v45 }
  0x98   :  { %v67_v50 = vmul.f32 %v103_v36, %v66_v48 }
  0x99   :  { %v86_v49 = vpack.c.bf16 %v84_v47, %v84_v47 }
  0x9a   :  { %v71_v52 = vsel %vm70_vm8, %v103_v36, %v67_v50 }
  0x9b   :  { %89 = vst.msk [vmem:[%s152_s3] sm:$0xf] %vm88_vm6, %v86_v49  ;;  %v73_v53 = vmul.f32 %v71_v52, %v49_v51 }
  0x9d   :  { %v79_v54 = vmul.f32 %v96_v39, %v73_v53 }
  0x9f   :  { %v85_v55 = vadd.f32 %v97_v42, %v79_v54 }
  0xa1   :  { %v87_v56 = vpack.c.bf16 %v85_v55, %v85_v55 }
  0xa3   :  { %90 = vst.msk [vmem:[%s152_s3 + $0x4] sm:$0xf] %vm88_vm6, %v87_v56 }

// kernel: gs_distilled_forward.19
= control target key start
LH: loop header
LB: loop body
LE: loop exit
PB: predicated region body
PF: predicated region fallthrough
CT: control target
= control target key end

     0   :  { %vm42_vm0 = vcmask 261120   ;;  %vm62_vm1 = vcmask 257024   ;;  %s124_s1 = inlined_call_operand.vmem [shape: bf16[32,32], index: 1, kind: input, shape index: {}]   ;;  %s125_s2 = inlined_call_operand.vmem [shape: f32[1,32], index: 2, kind: input, shape index: {}]   ;;  %s126_s0 = inlined_call_operand.vmem [shape: bf16[16,32], index: 0, kind: input, shape index: {}]   ;;  %s127_s3 = inlined_call_operand.vmem [shape: bf16[16,32], index: 3, kind: output, shape index: {}]  }
   0x1   :  { %v84_v0 = vld [vmem:[%s124_s1 + $0x8] sm:$0xff]  ;;  %v83_v1 = vld [vmem:[%s124_s1] sm:$0xff] }
   0x2   :  { %52 = vmatpush.bf16.msra.mxu0 %v84_v0  ;;  %v82_v2 = vld [vmem:[%s126_s0] sm:$0xff] }
   0x3   :  { %v85_v3 = vld [vmem:[%s125_s2] ss:$0 sm:$0xff] }
   0x6   :  { %53 = vmatpush.bf16.msra.mxu0 %v83_v1 }
   0x9   :  { %81 = vmatmul.msk.bf16.vlgmr.msra.gmra.mxu0 %vm42_vm0, %v82_v2 }
  0x86   :  { %v55_v4 = vpop.f32.mrf.mxu0 }
  0x87   :  { %v56_v5 = vadd.f32 %v85_v3, %v55_v4 }
  0x89   :  { %v60_v6 = vpack.c.bf16 %v56_v5, %v56_v5 }
  0x8b   :  { %63 = vst.msk [vmem:[%s127_s3] sm:$0xf] %vm62_vm1, %v60_v6 }
  0x8e   :  { %v57_v7 = vpop.f32.mrf.mxu0 }
  0x8f   :  { %v58_v8 = vadd.f32 %v85_v3, %v57_v7 }
  0x91   :  { %v61_v9 = vpack.c.bf16 %v58_v8, %v58_v8 }
  0x93   :  { %64 = vst.msk [vmem:[%s127_s3 + $0x4] sm:$0xf] %vm62_vm1, %v61_v9 }

// kernel: gs_distilled_forward.18
= control target key start
LH: loop header
LB: loop body
LE: loop exit
PB: predicated region body
PF: predicated region fallthrough
CT: control target
= control target key end

     0   :  { %s565_s9 = smov 0   ;;  %s636_s0 = inlined_call_operand.vmem [shape: bf16[2,8,96], index: 0, kind: input, shape index: {}]   ;;  %s637_s1 = inlined_call_operand.vmem [shape: f32[2,1,8], index: 1, kind: input, shape index: {}]   ;;  %s638_s2 = inlined_call_operand.vmem [shape: bf16[2,8,32], index: 2, kind: output, shape index: {}]  }
   0x1 LB: > { %s472_s10 = sadd.s32 4294967295, %s534_s9   ;;  %p476_p0 = scmp.ge.s32.totalorder %s534_s9, 1  ;;  %s534_s9 = sphi %s565_s9, %s12_s9  }
   0x2   : > { %p119_p1 = scmp.lt.s32.totalorder %s534_s9, 3 }
   0x4   : > { %p120_p2 = pnand %p476_p0, %p119_p1 }
   0x5   : > { %p142_p3 = scmp.lt.s32.totalorder (!%p120_p2), %s472_s10, 1  ;;  %s536_s18 = smov (!%p120_p2), 96  }
   0x6   : > { %123 = sbr.rel (%p120_p2) target bundleno = 1197 (0x4ad), region = 28  ;;  %s537_s19 = smov (!%p120_p2), 88  }
   0x7   : > { %s538_s20 = smov (!%p120_p2), 120   ;;  %s539_s21 = smov (!%p120_p2), 64  }
   0x8   : > { %s540_s22 = smov (!%p120_p2), 80   ;;  %s541_s23 = smov (!%p120_p2), 72  }
   0x9   : > { %s542_s24 = smov (!%p120_p2), 112   ;;  %s543_s25 = smov (!%p120_p2), 104  }
   0xa   : > { %s544_s28 = smov (!%p120_p2), 56   ;;  %s545_s29 = smov (!%p120_p2), 40  }
   0xb   : > { %s640_s10 = smov (!%p142_p3, %s472_s10), 1  ;;  %vm167_vm0 = vcmask 64512   ;;  %vm204_vm1 = vcmask 1043456   ;;  %s546_s30 = smov 48   ;;  %vm403_vm2 = vcmask 130048   ;;  %vm405_vm3 = vcmask 195584  }
   0xc   : > { %s477_s11 = sshll.u32 %s640_s10, 2  ;;  %s148_s17 = scalar_lea.vmem %s637_s1, %s640_s10  ;;  %vm408_vm4 = vcmask 257024  }
   0xd   : > { %s145_s14 = scalar_lea.vmem %s636_s0, %s477_s11  ;;  %v511_v11 = vld [vmem:[%s148_s17] ss:$0 sm:$0xff]  ;;  %s547_s3 = smov 8  }
   0xe   : > { %v154_v0 = vld [vmem:[%s145_s14] sm:$0xf]  ;;  %s548_s4 = smov 16   ;;  %s549_s5 = smov 24  }
   0xf   : > { %v163_v1 = vunpack.c.l.b16 %v154_v0  ;;  %v156_v3 = vunpack.c.l.bf16 %v154_v0  ;;  %s152_s8 = scalar_lea.vmem %s638_s2, %s477_s11 }
  0x11   : > { %v585_v2 = vpack.c.b16 %v163_v1, %v163_v1  ;;  %v157_v6 = vmul.f32 0.35351563, %v156_v3 }
  0x13   : > { %165 = vrot.lane.b32.xlu0 %v585_v2, %s536_s18  ;;  %224 = vrot.lane.b32.xlu1 %v585_v2, %s537_s19  ;;  %v158_v7 = vpack.c.bf16 %v157_v6, %v157_v6 }
  0x15   : > { %222 = vrot.lane.b32.xlu2 %v158_v7, %s538_s20 }
  0x1d   : > { %199 = vrot.lane.b32.xlu2 %v585_v2, %s539_s21 }
  0x25   : > { %280 = vrot.lane.b32.xlu2 %v585_v2, %s540_s22 }
  0x2d   : > { %336 = vrot.lane.b32.xlu2 %v585_v2, %s541_s23 }
  0x35   : > { %278 = vrot.lane.b32.xlu2 %v158_v7, %s542_s24 }
  0x3d   : > { %334 = vrot.lane.b32.xlu2 %v158_v7, %s543_s25 }
  0x6f   : > { %v223_v10 = vpop.permute.xlu2 %222 }
  0x77   : > { %v200_v16 = vpop.permute.xlu2 %199 }
  0x78   : > { %v206_v21 = vsel %vm204_vm1, %v200_v16, 0 }
  0x79   : > { %215 = vmatpush.bf16.msra.mxu1 %v206_v21 }
  0x7f   : > { %v281_v17 = vpop.permute.xlu2 %280 }
  0x80   : > { %v286_v19 = vsel %vm167_vm0, %v281_v17, 0 }
  0x81   : > { %295 = vmatpush.bf16.xpose.msrb.mxu1 %v286_v19 }
  0x85   : > { %v166_v4 = vpop.permute.xlu0 %165  ;;  %v225_v8 = vpop.permute.xlu1 %224 }
  0x86   : > { %v172_v5 = vsel %vm167_vm0, %v166_v4, 0  ;;  %v230_v9 = vsel %vm167_vm0, %v225_v8, 0 }
  0x87   : > { %181 = vmatpush.bf16.xpose.msra.mxu0 %v172_v5  ;;  %239 = vmatpush.bf16.xpose.msra.mxu2 %v230_v9  ;;  %v337_v18 = vpop.permute.xlu2 %336 }
  0x88   : > { %v342_v20 = vsel %vm167_vm0, %v337_v18, 0 }
  0x8e   : > { %479 = vmatmul.msk.bf16.vlgmr.msra.gmra.mxu0 %vm167_vm0, %v158_v7  ;;  %481 = vmatmul.msk.bf16.vlgmr.msra.gmra.mxu2 %vm167_vm0, %v223_v10 }
  0x8f   : > { %351 = vmatpush.bf16.xpose.msrb.mxu0 %v342_v20  ;;  %v279_v22 = vpop.permute.xlu2 %278 }
  0x97   : > { %v335_v23 = vpop.permute.xlu2 %334 }
  0x9e   : > { %485 = vmatmul.msk.bf16.vlgmr.msrb.gmra.mxu0 %vm167_vm0, %v335_v23 }
 0x10b   : > { %v183_v12 = vpop.f32.mrf.mxu0 }
 0x10c   : > { %v184_v13 = vadd.f32 %v511_v11, %v183_v12 }
 0x10e   : > { %v187_v14 = vsel %vm167_vm0, %v184_v13, -inf }
 0x10f   : > { %188 = vmax.xlane.f32.xlu0 %v187_v14 }
 0x111   : > { %v241_v24 = vpop.f32.mrf.mxu2 }
 0x112   : > { %v242_v25 = vadd.f32 %v511_v11, %v241_v24 }
 0x113   : > { %v185_v15 = vpop.f32.mrf.mxu0 }
 0x114   : > { %v245_v27 = vsel %vm167_vm0, %v242_v25, -inf }
 0x115   : > { %246 = vmax.xlane.f32.xlu2 %v245_v27 }
 0x119   : > { %v243_v30 = vpop.f32.mrf.mxu2 }
 0x11b   : > { %v353_v33 = vpop.f32.mrf.mxu0 }
 0x11c   : > { %v354_v34 = vadd.f32 %v511_v11, %v353_v33 }
 0x11e   : > { %v357_v35 = vsel %vm167_vm0, %v354_v34, -inf }
 0x123   : > { %v355_v37 = vpop.f32.mrf.mxu0 }
 0x182   : > { %v189_v26 = vpop.xlane.xlu0 %188 }
 0x183   : > { %v190_v28 = vsub.f32 %v184_v13, %v189_v26 }
 0x185   : > { %v191_v29 = vmul.f32 1.442695, %v190_v28 }
 0x187   : > { %512 = vpow2.f32 %v191_v29 }
 0x188   : > { %v247_v42 = vpop.xlane.xlu2 %246 }
 0x189   : > { %v248_v44 = vsub.f32 %v242_v25, %v247_v42 }
 0x18b   : > { %v249_v45 = vmul.f32 1.442695, %v248_v44 }
 0x18d   : > { %v513_v31 = vpop.eup %512 }
 0x18e   : > { %v193_v32 = vsel %vm167_vm0, %v513_v31, 0.0 }
 0x18f   : > { %194 = vadd.xlane.f32.xlu1 %v193_v32 }
 0x197   : > { %358 = vmax.xlane.f32.xlu1 %v357_v35 }
 0x1b0   : > { %257 = vrot.lane.b32.xlu1 %v585_v2, %s544_s28 }
 0x1b8   : > { %369 = vrot.lane.b32.xlu1 %v585_v2, %s545_s29 }
 0x202   : > { %v195_v36 = vpop.xlane.xlu1 %194 }
 0x203   : > { %514 = vrcp.f32 %v195_v36 }
 0x204   : > { %516 = vpow2.f32 %v249_v45 }
 0x209   : > { %v515_v38 = vpop.eup %514 }
 0x20a   : > { %v197_v39 = vmul.f32 %v515_v38, %v513_v31  ;;  %v359_v46 = vpop.xlane.xlu1 %358  ;;  %v517_v52 = vpop.eup %516 }
 0x20b   : > { %v360_v49 = vsub.f32 %v354_v34, %v359_v46  ;;  %v251_v54 = vsel %vm167_vm0, %v517_v52, 0.0 }
 0x20c   : > { %v198_v40 = vpack.c.bf16 %v197_v39, %v197_v39 }
 0x20d   : > { %v361_v51 = vmul.f32 1.442695, %v360_v49 }
 0x20e   : > { %480 = vmatmul.msk.bf16.vlgmr.msra.gmra.mxu1 %vm167_vm0, %v198_v40 }
 0x20f   : > { %518 = vpow2.f32 %v361_v51 }
 0x215   : > { %v519_v55 = vpop.eup %518 }
 0x216   : > { %v363_v56 = vsel %vm167_vm0, %v519_v55, 0.0 }
 0x21e   : > { %483 = vmatmul.msk.bf16.vlgmr.msrb.gmra.mxu1 %vm167_vm0, %v279_v22 }
 0x222   : > { %v258_v57 = vpop.permute.xlu1 %257 }
 0x223   : > { %v263_v58 = vsel %vm204_vm1, %v258_v57, 0 }
 0x224   : > { %272 = vmatpush.bf16.msra.mxu3 %v263_v58 }
 0x22a   : > { %v370_v59 = vpop.permute.xlu1 %369 }
 0x22b   : > { %v375_v60 = vsel %vm204_vm1, %v370_v59, 0 }
 0x22c   : > { %384 = vmatpush.bf16.msrb.mxu2 %v375_v60 }
 0x28b   : > { %v613_v41 = vpop.f32.mrf.mxu1 }
 0x293   : > { %v219_v43 = vpop.f32.mrf.mxu1 }
 0x29b   : > { %v297_v47 = vpop.f32.mrf.mxu1 }
 0x29c   : > { %v298_v48 = vadd.f32 %v511_v11, %v297_v47 }
 0x29e   : > { %v301_v50 = vsel %vm167_vm0, %v298_v48, -inf }
 0x29f   : > { %302 = vmax.xlane.f32.xlu0 %v301_v50 }
 0x2a3   : > { %v299_v53 = vpop.f32.mrf.mxu1 }
 0x2a7   : > { %252 = vadd.xlane.f32.xlu0 %v251_v54 }
 0x2af   : > { %364 = vadd.xlane.f32.xlu0 %v363_v56 }
 0x312   : > { %v303_v61 = vpop.xlane.xlu0 %302 }
 0x313   : > { %v304_v62 = vsub.f32 %v298_v48, %v303_v61 }
 0x315   : > { %v305_v63 = vmul.f32 1.442695, %v304_v62 }
 0x317   : > { %520 = vpow2.f32 %v305_v63 }
 0x31a   : > { %v253_v0 = vpop.xlane.xlu0 %252 }
 0x31b   : > { %522 = vrcp.f32 %v253_v0 }
 0x31d   : > { %v521_v1 = vpop.eup %520 }
 0x31e   : > { %v307_v3 = vsel %vm167_vm0, %v521_v1, 0.0 }
 0x31f   : > { %308 = vadd.xlane.f32.xlu0 %v307_v3 }
 0x321   : > { %v523_v4 = vpop.eup %522 }
 0x322   : > { %v365_v5 = vpop.xlane.xlu0 %364  ;;  %v255_v6 = vmul.f32 %v523_v4, %v517_v52 }
 0x323   : > { %524 = vrcp.f32 %v365_v5 }
 0x324   : > { %v256_v7 = vpack.c.bf16 %v255_v6, %v255_v6 }
 0x326   : > { %482 = vmatmul.msk.bf16.vlgmr.msra.gmra.mxu3 %vm167_vm0, %v256_v7 }
 0x329   : > { %v525_v8 = vpop.eup %524 }
 0x32a   : > { %v367_v9 = vmul.f32 %v525_v8, %v519_v55 }
 0x32c   : > { %v368_v10 = vpack.c.bf16 %v367_v9, %v367_v9 }
 0x32e   : > { %486 = vmatmul.msk.bf16.vlgmr.msrb.gmra.mxu2 %vm167_vm0, %v368_v10 }
 0x333   : > { %313 = vrot.lane.b32.xlu0 %v585_v2, %s546_s30 }
 0x392   : > { %v309_v11 = vpop.xlane.xlu0 %308 }
 0x393   : > { %526 = vrcp.f32 %v309_v11 }
 0x399   : > { %v527_v12 = vpop.eup %526 }
 0x39a   : > { %v311_v13 = vmul.f32 %v527_v12, %v521_v1 }
 0x39c   : > { %v312_v16 = vpack.c.bf16 %v311_v13, %v311_v13 }
 0x3a5   : > { %v314_v14 = vpop.permute.xlu0 %313 }
 0x3a6   : > { %v319_v15 = vsel %vm204_vm1, %v314_v14, 0 }
 0x3a7   : > { %328 = vmatpush.bf16.msrb.mxu3 %v319_v15 }
 0x3a9   : > { %v274_v17 = vpop.f32.mrf.mxu3 }
 0x3aa   : > { %484 = vmatmul.msk.bf16.vlgmr.msrb.gmra.mxu3 %vm167_vm0, %v312_v16  ;;  %391 = vrot.lane.b32.xlu2 %v274_v17, %s547_s3 }
 0x3b1   : > { %v276_v18 = vpop.f32.mrf.mxu3  ;;  %v386_v19 = vpop.f32.mrf.mxu2 }
 0x3b9   : > { %v388_v20 = vpop.f32.mrf.mxu2 }
 0x404   : > { %v392_v23 = vpop.permute.xlu2 %391 }
 0x405   : > { %v402_v24 = vsel %vm167_vm0, %v613_v41, %v392_v23 }
 0x42d   : > { %v330_v21 = vpop.f32.mrf.mxu3 }
 0x42e   : > { %395 = vrot.lane.b32.xlu1 %v330_v21, %s548_s4 }
 0x435   : > { %v332_v2 = vpop.f32.mrf.mxu3 }
 0x436   : > { %399 = vrot.lane.b32.xlu1 %v386_v19, %s549_s5 }
 0x4a0   : > { %v396_v22 = vpop.permute.xlu1 %395 }
 0x4a1   : > { %v404_v25 = vsel %vm403_vm2, %v402_v24, %v396_v22 }
 0x4a8   : > { %v400_v26 = vpop.permute.xlu1 %399 }
 0x4a9   : > { %v406_v27 = vsel %vm405_vm3, %v404_v25, %v400_v26 }
 0x4aa   : > { %v407_v28 = vpack.c.bf16 %v406_v27, %v406_v27 }
 0x4ac   : > { %409 = vst.msk [vmem:[%s152_s8] sm:$0xf] %vm408_vm4, %v407_v28 }
 0x4ad PF: > { %s12_s9 = sadd.s32 1, %s534_s9  }
 0x4ae   : > { %p9_p4 = scmp.ge.s32.totalorder %s12_s9, 4  }
 0x4b0   :  { %11 = sbr.rel (!%p9_p4) target bundleno = 1 (0x1), region = 61 }

// kernel: gs_distilled_forward.21
= control target key start
LH: loop header
LB: loop body
LE: loop exit
PB: predicated region body
PF: predicated region fallthrough
CT: control target
= control target key end

     0   :  { %vm42_vm0 = vcmask 261120   ;;  %vm80_vm1 = vcmask 519168   ;;  %s146_s1 = inlined_call_operand.vmem [shape: bf16[32,64], index: 1, kind: input, shape index: {}]   ;;  %s147_s2 = inlined_call_operand.vmem [shape: f32[1,64], index: 2, kind: input, shape index: {}]   ;;  %s148_s0 = inlined_call_operand.vmem [shape: bf16[16,32], index: 0, kind: input, shape index: {}]   ;;  %s149_s3 = inlined_call_operand.vmem [shape: bf16[16,64], index: 3, kind: output, shape index: {}]  }
   0x1   :  { %v102_v0 = vld [vmem:[%s146_s1 + $0x8] sm:$0xff]  ;;  %v101_v1 = vld [vmem:[%s146_s1] sm:$0xff] }
   0x2   :  { %52 = vmatpush.bf16.msra.mxu0 %v102_v0  ;;  %v100_v2 = vld [vmem:[%s148_s0] sm:$0xff] }
   0x3   :  { %v103_v3 = vld [vmem:[%s147_s2] ss:$0 sm:$0xff] }
   0x6   :  { %53 = vmatpush.bf16.msra.mxu0 %v101_v1 }
   0x9   :  { %99 = vmatmul.msk.bf16.vlgmr.msra.gmra.mxu0 %vm42_vm0, %v100_v2 }
  0x86   :  { %v55_v4 = vpop.f32.mrf.mxu0 }
  0x87   :  { %v56_v5 = vadd.f32 %v103_v3, %v55_v4 }
  0x89   :  { %v60_v6 = vmul.f32 %v56_v5, %v56_v5 }
  0x8b   :  { %v62_v7 = vmul.f32 %v60_v6, %v56_v5 }
  0x8d   :  { %v64_v8 = vmul.f32 0.044715, %v62_v7 }
  0x8e   :  { %v57_v9 = vpop.f32.mrf.mxu0 }
  0x8f   :  { %v66_v10 = vadd.f32 %v64_v8, %v56_v5  ;;  %v58_v11 = vadd.f32 %v103_v3, %v57_v9 }
  0x91   :  { %v68_v12 = vmul.f32 0.7978846, %v66_v10  ;;  %v61_v13 = vmul.f32 %v58_v11, %v58_v11 }
  0x93   :  { %104 = vtanh.f32 %v68_v12  ;;  %v63_v14 = vmul.f32 %v61_v13, %v58_v11 }
  0x95   :  { %v65_v15 = vmul.f32 0.044715, %v63_v14 }
  0x97   :  { %v67_v16 = vadd.f32 %v65_v15, %v58_v11 }
  0x99   :  { %v105_v17 = vpop.eup %104  ;;  %v69_v18 = vmul.f32 0.7978846, %v67_v16 }
  0x9a   :  { %v72_v19 = vadd.f32 1.0, %v105_v17 }
  0x9b   :  { %106 = vtanh.f32 %v69_v18 }
  0x9c   :  { %v74_v20 = vmul.f32 0.5, %v72_v19 }
  0x9e   :  { %v76_v21 = vmul.f32 %v74_v20, %v56_v5 }
  0xa0   :  { %v78_v22 = vpack.c.bf16 %v76_v21, %v76_v21 }
  0xa1   :  { %v107_v23 = vpop.eup %106 }
  0xa2   :  { %81 = vst.msk [vmem:[%s149_s3] sm:$0xf] %vm80_vm1, %v78_v22  ;;  %v73_v24 = vadd.f32 1.0, %v107_v23 }
  0xa4   :  { %v75_v25 = vmul.f32 0.5, %v73_v24 }
  0xa6   :  { %v77_v26 = vmul.f32 %v75_v25, %v58_v11 }
  0xa8   :  { %v79_v27 = vpack.c.bf16 %v77_v26, %v77_v26 }
  0xaa   :  { %82 = vst.msk [vmem:[%s149_s3 + $0x4] sm:$0xf] %vm80_vm1, %v79_v27 }

// kernel: gs_distilled_forward.20
= control target key start
LH: loop header
LB: loop body
LE: loop exit
PB: predicated region body
PF: predicated region fallthrough
CT: control target
= control target key end

     0   :  { %vm27_vm0 = vcmask 261120   ;;  %v123_v14 = vmov 32.0   ;;  %vm99_vm6 = vcmask 257024   ;;  %s173_s0 = inlined_call_operand.vmem [shape: bf16[16,32], index: 0, kind: input, shape index: {}]   ;;  %s174_s1 = inlined_call_operand.vmem [shape: bf16[16,32], index: 1, kind: input, shape index: {}]   ;;  %s175_s2 = inlined_call_operand.vmem [shape: f32[1,32], index: 2, kind: input, shape index: {}]   ;;  %s176_s3 = inlined_call_operand.vmem [shape: f32[1,32], index: 3, kind: input, shape index: {}]   ;;  %s177_s4 = inlined_call_operand.vmem [shape: bf16[16,32], index: 4, kind: output, shape index: {}]  }
   0x1   :  { %v107_v0 = vld [vmem:[%s173_s0] sm:$0xff]   ;;  %117 = vrcp.f32 %v123_v14 }
   0x2   :  { %v111_v1 = vld [vmem:[%s174_s1] sm:$0xff]   ;;  %v108_v2 = vunpack.c.l.bf16 %v107_v0  ;;  %v109_v4 = vunpack.c.h.bf16 %v107_v0 }
   0x3   :  { %v112_v3 = vunpack.c.l.bf16 %v111_v1  ;;  %v113_v5 = vunpack.c.h.bf16 %v111_v1  ;;  %v115_v45 = vld [vmem:[%s175_s2] ss:$0 sm:$0xff] }
   0x4   :  { %v116_v48 = vld [vmem:[%s176_s3] ss:$0 sm:$0xff] }
   0x5   :  { %v25_v6 = vadd.f32 %v112_v3, %v108_v2  ;;  %v155_v9 = vadd.f32 %v113_v5, %v109_v4 }
   0x7   :  { %v28_v7 = vsel %vm27_vm0, %v25_v6, 0.0  ;;  %v43_v8 = vmul.f32 %v25_v6, %v25_v6  ;;  %v44_v11 = vmul.f32 %v155_v9, %v155_v9  ;;  %v31_v12 = vsel %vm27_vm0, %v155_v9, 0.0  ;;  %v118_v15 = vpop.eup %117 }
   0x8   :  { %29 = vadd.xlane.f32.xlu0 %v28_v7  ;;  %v35_v16 = vmul.f32 32.0, %v118_v15  ;;  %vm39_vm1 = vweird.f32 %v118_v15 }
   0x9   :  { %v45_v10 = vsel %vm27_vm0, %v43_v8, 0.0  ;;  %v48_v13 = vsel %vm27_vm0, %v44_v11, 0.0 }
   0xa   :  { %46 = vadd.xlane.f32.xlu1 %v45_v10  ;;  %v36_v17 = vsub.f32 1.0, %v35_v16 }
   0xc   :  { %v37_v18 = vmul.f32 %v118_v15, %v36_v17 }
   0xe   :  { %v38_v19 = vadd.f32 %v118_v15, %v37_v18 }
  0x10   :  { %32 = vadd.xlane.f32.xlu0 %v31_v12  ;;  %v40_v20 = vsel %vm39_vm1, %v118_v15, %v38_v19 }
  0x12   :  { %49 = vadd.xlane.f32.xlu1 %v48_v13 }
  0x7b   :  { %v30_v21 = vpop.xlane.xlu0 %29 }
  0x7c   :  { %v41_v22 = vmul.f32 %v40_v20, %v30_v21 }
  0x7d   :  { %v47_v23 = vpop.xlane.xlu1 %46 }
  0x7e   :  { %v53_v24 = vmul.f32 %v41_v22, %v41_v22  ;;  %v51_v25 = vmul.f32 %v47_v23, %v40_v20  ;;  %v59_v44 = vsub.f32 %v25_v6, %v41_v22 }
  0x80   :  { %v55_v26 = vsub.f32 %v51_v25, %v53_v24 }
  0x82   :  { %v57_v27 = vmax.f32 %v55_v26, 0.0 }
  0x83   :  { %v33_v28 = vpop.xlane.xlu0 %32 }
  0x84   :  { %v61_v29 = vadd.f32 1e-12, %v57_v27  ;;  %v42_v30 = vmul.f32 %v40_v20, %v33_v28 }
  0x85   :  { %v50_v31 = vpop.xlane.xlu1 %49 }
  0x86   :  { %119 = vrsqrt.f32 %v61_v29  ;;  %v54_v32 = vmul.f32 %v42_v30, %v42_v30  ;;  %v52_v33 = vmul.f32 %v50_v31, %v40_v20  ;;  %vm69_vm3 = vweird.f32 %v61_v29 }
  0x87   :  { %v60_v57 = vsub.f32 %v155_v9, %v42_v30 }
  0x88   :  { %v56_v34 = vsub.f32 %v52_v33, %v54_v32 }
  0x8a   :  { %v58_v35 = vmax.f32 %v56_v34, 0.0 }
  0x8c   :  { %v120_v36 = vpop.eup %119  ;;  %v62_v38 = vadd.f32 1e-12, %v58_v35 }
  0x8d   :  { %v64_v37 = vmul.f32 %v120_v36, %v61_v29  ;;  %vm70_vm2 = vweird.f32 %v120_v36 }
  0x8e   :  { %121 = vrsqrt.f32 %v62_v38  ;;  %vm71_vm4 = vmor %vm69_vm3, %vm70_vm2  ;;  %vm79_vm7 = vweird.f32 %v62_v38 }
  0x8f   :  { %v65_v39 = vmul.f32 %v120_v36, %v64_v37 }
  0x91   :  { %v66_v40 = vmul.f32 0.5, %v65_v39 }
  0x93   :  { %v67_v41 = vsub.f32 1.5, %v66_v40 }
  0x94   :  { %v122_v42 = vpop.eup %121 }
  0x95   :  { %v68_v43 = vmul.f32 %v120_v36, %v67_v41  ;;  %v74_v46 = vmul.f32 %v122_v42, %v62_v38  ;;  %vm80_vm5 = vweird.f32 %v122_v42 }
  0x96   :  { %vm81_vm8 = vmor %vm79_vm7, %vm80_vm5 }
  0x97   :  { %v72_v47 = vsel %vm71_vm4, %v120_v36, %v68_v43  ;;  %v75_v50 = vmul.f32 %v122_v42, %v74_v46 }
  0x98   :  { %v83_v49 = vmul.f32 %v72_v47, %v59_v44 }
  0x99   :  { %v76_v52 = vmul.f32 0.5, %v75_v50 }
  0x9a   :  { %v89_v51 = vmul.f32 %v115_v45, %v83_v49 }
  0x9b   :  { %v77_v54 = vsub.f32 1.5, %v76_v52 }
  0x9c   :  { %v95_v53 = vadd.f32 %v116_v48, %v89_v51 }
  0x9d   :  { %v78_v56 = vmul.f32 %v122_v42, %v77_v54 }
  0x9e   :  { %v97_v55 = vpack.c.bf16 %v95_v53, %v95_v53 }
  0x9f   :  { %v82_v58 = vsel %vm81_vm8, %v122_v42, %v78_v56 }
  0xa0   :  { %100 = vst.msk [vmem:[%s177_s4] sm:$0xf] %vm99_vm6, %v97_v55  ;;  %v84_v59 = vmul.f32 %v82_v58, %v60_v57 }
  0xa2   :  { %v90_v60 = vmul.f32 %v115_v45, %v84_v59 }
  0xa4   :  { %v96_v61 = vadd.f32 %v116_v48, %v90_v60 }
  0xa6   :  { %v98_v62 = vpack.c.bf16 %v96_v61, %v96_v61 }
  0xa8   :  { %101 = vst.msk [vmem:[%s177_s4 + $0x4] sm:$0xf] %vm99_vm6, %v98_v62 }

// kernel: gs_distilled_forward.22
= control target key start
LH: loop header
LB: loop body
LE: loop exit
PB: predicated region body
PF: predicated region fallthrough
CT: control target
= control target key end

     0   :  { %vm58_vm0 = vcmask 523264   ;;  %vm78_vm1 = vcmask 257024   ;;  %s156_s1 = inlined_call_operand.vmem [shape: bf16[64,32], index: 1, kind: input, shape index: {}]   ;;  %s157_s2 = inlined_call_operand.vmem [shape: f32[1,32], index: 2, kind: input, shape index: {}]   ;;  %s158_s0 = inlined_call_operand.vmem [shape: bf16[16,64], index: 0, kind: input, shape index: {}]   ;;  %s159_s3 = inlined_call_operand.vmem [shape: bf16[16,32], index: 3, kind: output, shape index: {}]  }
   0x1   :  { %v110_v0 = vld [vmem:[%s156_s1 + $0x18] sm:$0xff]  ;;  %v109_v1 = vld [vmem:[%s156_s1 + $0x10] sm:$0xff]  ;;  %v108_v2 = vld [vmem:[%s156_s1 + $0x8] sm:$0xff] }
   0x2   :  { %66 = vmatpush.bf16.msra.mxu0 %v110_v0  ;;  %v107_v3 = vld [vmem:[%s156_s1] sm:$0xff] }
   0x3   :  { %v106_v4 = vld [vmem:[%s158_s0] sm:$0xff] }
   0x4   :  { %v111_v5 = vld [vmem:[%s157_s2] ss:$0 sm:$0xff] }
   0x6   :  { %67 = vmatpush.bf16.msra.mxu0 %v109_v1 }
   0xa   :  { %68 = vmatpush.bf16.msra.mxu0 %v108_v2 }
   0xe   :  { %69 = vmatpush.bf16.msra.mxu0 %v107_v3 }
  0x11   :  { %105 = vmatmul.msk.bf16.vlgmr.msra.gmra.mxu0 %vm58_vm0, %v106_v4 }
  0x8e   :  { %v71_v6 = vpop.f32.mrf.mxu0 }
  0x8f   :  { %v72_v7 = vadd.f32 %v111_v5, %v71_v6 }
  0x91   :  { %v76_v8 = vpack.c.bf16 %v72_v7, %v72_v7 }
  0x93   :  { %79 = vst.msk [vmem:[%s159_s3] sm:$0xf] %vm78_vm1, %v76_v8 }
  0x96   :  { %v73_v9 = vpop.f32.mrf.mxu0 }
  0x97   :  { %v74_v10 = vadd.f32 %v111_v5, %v73_v9 }
  0x99   :  { %v77_v11 = vpack.c.bf16 %v74_v10, %v74_v10 }
  0x9b   :  { %80 = vst.msk [vmem:[%s159_s3 + $0x4] sm:$0xf] %vm78_vm1, %v77_v11 }

// kernel: gs_distilled_forward.31
= control target key start
LH: loop header
LB: loop body
LE: loop exit
PB: predicated region body
PF: predicated region fallthrough
CT: control target
= control target key end

     0   :  { %s151_s0 = inlined_call_operand.vmem [shape: bf16[2,32], index: 0, kind: input, shape index: {}]   ;;  %s152_s1 = inlined_call_operand.vmem [shape: f32[32,16], index: 1, kind: input, shape index: {}]   ;;  %s153_s2 = inlined_call_operand.vmem [shape: f32[2,16], index: 2, kind: input, shape index: {}]   ;;  %s154_s3 = inlined_call_operand.hbm [shape: f32[1,1], index: 3, kind: output, shape index: {}]  }
   0x1   :  { %v20_v0 = vld [vmem:[%s152_s1 + $0x18] sm:$0xff]  ;;  %v19_v1 = vld [vmem:[%s152_s1 + $0x10] sm:$0xff]  ;;  %v15_v2 = vld [vmem:[%s151_s0] sm:$0x1] }
   0x2   :  { %37 = vmatpush.msra.mxu0 %v20_v0 }
   0x3   :  { %8 = vsyncpa [#allocation3], 0  ;;  %v18_v3 = vld [vmem:[%s152_s1 + $0x8] sm:$0xff]  ;;  %v17_v4 = vld [vmem:[%s152_s1] sm:$0xff]  ;;  %v16_v5 = vunpack.c.l.bf16 %v15_v2  ;;  %vm21_vm0 = vcmask 261120   ;;  %vm48_vm1 = vcmask 123904  }
   0x4   :  { %38 = vmatpush.msra.mxu0 %v19_v1  ;;  %v45_v6 = vld [vmem:[%s153_s2] sm:$0x3]  ;;  %v108_v11 = vmov 32.0   ;;  %s75_s2 = sshll.u32 %s154_s3, 4  ;;  %s109_s27 = smov [#allocation2]   ;;  %s76_s2 = int_to_ptr.hbm [resolvable:$true] %s75_s2 }
   0x5   :  { %92 = vrcp.f32 %v108_v11 }
   0x6   :  { %39 = vmatpush.msra.mxu0 %v18_v3 }
   0x8   :  { %40 = vmatpush.msra.mxu0 %v17_v4 }
   0x9   :  { %85 = vmatmul.msk.f32.vlgmr.msra.gmra.mxu0 %vm21_vm0, %v16_v5 }
   0xb   :  { %v93_v12 = vpop.eup %92 }
   0xc   :  { %v60_v13 = vmul.f32 32.0, %v93_v12  ;;  %vm64_vm2 = vweird.f32 %v93_v12 }
   0xe   :  { %v61_v14 = vsub.f32 1.0, %v60_v13 }
  0x10   :  { %v62_v18 = vmul.f32 %v93_v12, %v61_v14 }
  0x12   :  { %v63_v21 = vadd.f32 %v93_v12, %v62_v18 }
  0x14   :  { %v65_v24 = vsel %vm64_vm2, %v93_v12, %v63_v21 }
  0x86   :  { %v42_v7 = vpop.f32.mrf.mxu0 }
  0x87   :  { %v46_v8 = vsub.f32 %v42_v7, %v45_v6 }
  0x89   :  { %v47_v9 = vmul.f32 %v46_v8, %v46_v8 }
  0x8b   :  { %v49_v10 = vsel %vm48_vm1, %v47_v9, 0.0 }
  0x8c   :  { %50 = vadd.xlane.f32.xlu0 %v49_v10 }
  0xff   :  { %v51_v15 = vpop.xlane.xlu0 %50 }
 0x100   :  { %v52_v16 = vrot.slane %v51_v15, 4 }
 0x102   :  { %v53_v17 = vadd.f32 %v52_v16, %v51_v15 }
 0x104   :  { %v54_v19 = vrot.slane %v53_v17, 2 }
 0x106   :  { %v55_v20 = vadd.f32 %v54_v19, %v53_v17 }
 0x108   :  { %v56_v22 = vrot.slane %v55_v20, 1 }
 0x10a   :  { %v57_v23 = vadd.f32 %v56_v22, %v55_v20 }
 0x10c   :  { %86 = vpush %v57_v23 }
 0x10d   :  { %88 = vpush %v65_v24 }
 0x13d   :  { %s87_s24 = spop %86 }
 0x13e   :  { %s89_s25 = spop %88 }
 0x13f   :  { %s67_s26 = smul.f32 %s89_s25, %s87_s24 }
 0x141   :  { %69 = sst [smem:[#allocation2]] %s67_s26 }
 0x142   :  { %78 = dma.smem_to_hbm %s109_s27, 16, %s76_s2, [#allocation3]  }
 0x143   :  { %106 = dma.done.wait [#allocation3], 16  }
 0x144   :  { %107 = vsyncadd [#allocation3], 4294967280 }
 0x145   :  { %83 = sfence }
 0x146   :  { %84 = vsyncpa [#allocation3], 1 }

</bundles_post_ra>
